<compile_context>
chip_gen: v7x
topology: tpu7x:2x2x1
jax: 0.10.0
libtpu: 0.0.40
codegen_flags: <defaults>
</compile_context>

<pallas_src>
import jax
import jax.numpy as jnp
from jax.experimental import pallas as pl
from jax.experimental.pallas import tpu as pltpu


def _round_up(x, m):
    return ((x + m - 1) // m) * m


def critic_kernel(scalars_ref, x_ref, w1_ref, b1_ref, w2_ref, b2_ref, w3_ref,
                  o_ref):
    # Scalars live in SMEM: [prelu_alpha1, prelu_alpha2, fc3_bias]
    a1 = scalars_ref[0]
    a2 = scalars_ref[1]
    b3 = scalars_ref[2]

    # x arrives f32 from HBM; cast to the matmul operand dtype in-kernel so the
    # bf16 MXU path costs no extra HBM pass in the wrapper.
    x = x_ref[...].astype(w1_ref.dtype)                             # [TB, S]

    # fc1 + PReLU1 (f32 accumulation, PReLU in f32)
    h1 = jnp.dot(x, w1_ref[...], preferred_element_type=jnp.float32) + b1_ref[...]
    h1 = jnp.where(h1 > 0, h1, a1 * h1)

    # fc2 + PReLU2
    h2 = jnp.dot(h1.astype(w2_ref.dtype), w2_ref[...],
                 preferred_element_type=jnp.float32) + b2_ref[...]
    h2 = jnp.where(h2 > 0, h2, a2 * h2)

    # fc3 (N=1) on the MXU: the MXU is nearly idle here, so a 1-column matmul is
    # free, while a cross-lane VPU/XLU reduction would sit on the critical slot.
    out = jnp.dot(h2.astype(w3_ref.dtype), w3_ref[...],
                  preferred_element_type=jnp.float32) + b3           # [TB, 1]
    o_ref[...] = out.astype(o_ref.dtype)


def _pick_batch_tile(B, *, single_step_max=1024, target_tile=4096):
    """Pick (TB, B_pad). Small/medium B -> one grid step. Large B -> an even
    number of ~target_tile-row steps (v7x dual-TC friendly), with TB derived
    from cdiv(B, steps) so batch padding stays bounded."""
    b8 = _round_up(max(B, 1), 8)
    if b8 <= single_step_max:
        return b8, b8                                   # grid = (1,)
    steps = _round_up(max(2, pl.cdiv(b8, target_tile)), 2)
    tb = _round_up(pl.cdiv(b8, steps), 256)
    return tb, _round_up(b8, tb)


def critic_forward(x, params, *, compute_dtype=jnp.float32,
                   single_step_max=1024, target_tile=4096):
    """x: [B, S] float32, params: dict of weights. Returns [B, 1] float32."""
    B, S = x.shape
    H = params["w1"].shape[1]  # 128

    TB, B_pad = _pick_batch_tile(B, single_step_max=single_step_max,
                                 target_tile=target_tile)
    if B_pad != B:
        x = jnp.pad(x, ((0, B_pad - B), (0, 0)))
    grid = (B_pad // TB,)

    # Weights in compute_dtype (bf16 valid on v5e/v6e/v7x MXUs); biases, PReLU
    # and accumulation stay f32. x is NOT cast here (done in-kernel).
    w1_c = params["w1"].astype(compute_dtype)           # [S, H]
    w2_c = params["w2"].astype(compute_dtype)           # [H, H]
    w3_c = params["w3"].astype(compute_dtype)           # [H, 1]
    b1 = params["b1"].astype(jnp.float32)                # [1, H]
    b2 = params["b2"].astype(jnp.float32)                # [1, H]

    # Scalars for the SMEM path: PReLU alphas + fc3 bias.
    scalars = jnp.stack([
        params["a1"].reshape(()),
        params["a2"].reshape(()),
        params["b3"].reshape(()),
    ]).astype(jnp.float32)

    w_itemsize = jnp.dtype(compute_dtype).itemsize
    cost = pl.CostEstimate(
        flops=2 * B_pad * (S * H + H * H + H),
        transcendentals=0,
        bytes_accessed=(B_pad * S) * 4 + B_pad * 4
        + (S * H + H * H + H) * w_itemsize + 2 * H * 4 + 3 * 4,
    )

    # x is double-buffered by the pipeline; weights are resident. Only raise the
    # scoped-VMEM limit when the footprint actually needs it (v5e default 16 MiB).
    vmem_est = (2 * TB * S * 4 + 2 * TB * 4
                + (S * H + H * H + H) * w_itemsize + 2 * H * 4)
    vmem_limit = None
    if vmem_est > 12 * 1024 * 1024:
        vmem_limit = min(int(vmem_est * 2), 100 * 1024 * 1024)

    out = pl.pallas_call(
        critic_kernel,
        out_shape=jax.ShapeDtypeStruct((B_pad, 1), jnp.float32),
        grid=grid,
        in_specs=[
            pl.BlockSpec(memory_space=pltpu.MemorySpace.SMEM),   # alphas + b3
            pl.BlockSpec((TB, S), lambda i: (i, 0)),             # x: streams (f32)
            pl.BlockSpec((S, H), lambda i: (0, 0)),              # w1: resident
            pl.BlockSpec((1, H), lambda i: (0, 0)),              # b1: resident
            pl.BlockSpec((H, H), lambda i: (0, 0)),              # w2: resident
            pl.BlockSpec((1, H), lambda i: (0, 0)),              # b2: resident
            pl.BlockSpec((H, 1), lambda i: (0, 0)),              # w3: resident
        ],
        out_specs=pl.BlockSpec((TB, 1), lambda i: (i, 0)),
        compiler_params=pltpu.CompilerParams(
            dimension_semantics=("parallel",),
            vmem_limit_bytes=vmem_limit),
        cost_estimate=cost,
    )(scalars, x, w1_c, b1, w2_c, b2, w3_c)

    return out[:B]


def init_params(key, state_size, hidden=128):
    """Deterministic init mirroring nn.Linear (uniform +/- 1/sqrt(fan_in)) and
    PReLU default alpha=0.25. Weights stored transposed as [in, out]."""
    ks = jax.random.split(key, 6)

    def linear(kw, kb, fan_in, fan_out):
        bound = 1.0 / jnp.sqrt(fan_in)
        w = jax.random.uniform(kw, (fan_in, fan_out), jnp.float32, -bound, bound)
        b = jax.random.uniform(kb, (1, fan_out), jnp.float32, -bound, bound)
        return w, b

    w1, b1 = linear(ks[0], ks[1], state_size, hidden)
    w2, b2 = linear(ks[2], ks[3], hidden, hidden)
    w3, b3 = linear(ks[4], ks[5], hidden, 1)
    return {
        "w1": w1, "b1": b1, "a1": jnp.full((1, 1), 0.25, jnp.float32),
        "w2": w2, "b2": b2, "a2": jnp.full((1, 1), 0.25, jnp.float32),
        "w3": w3, "b3": b3,
    }


def reference_forward(x, p):
    h1 = x @ p["w1"] + p["b1"]
    h1 = jnp.where(h1 > 0, h1, p["a1"][0, 0] * h1)
    h2 = h1 @ p["w2"] + p["b2"]
    h2 = jnp.where(h2 > 0, h2, p["a2"][0, 0] * h2)
    return h2 @ p["w3"] + p["b3"]


if __name__ == "__main__":
    key = jax.random.PRNGKey(0)
    k_x, k_p, k_x2 = jax.random.split(key, 3)

    S = 32
    params = init_params(k_p, S)

    # Small batch (not a multiple of 8) -> single-step grid, batch padding path.
    B = 500
    x = jax.random.normal(k_x, (B, S), dtype=jnp.float32)
    ref = reference_forward(x, params)

    out = jax.block_until_ready(critic_forward(x, params))
    assert out.shape == (B, 1), out.shape
    assert jnp.allclose(out, ref, atol=2e-3, rtol=2e-3), "f32 kernel mismatch"

    # bf16 matmul operands (valid on v5e/v6e/v7x MXUs), f32 accumulation; x cast
    # happens inside the kernel so there is no extra HBM pass.
    out_bf16 = jax.block_until_ready(
        critic_forward(x, params, compute_dtype=jnp.bfloat16))
    assert out_bf16.shape == (B, 1), out_bf16.shape
    assert jnp.allclose(out_bf16, ref, atol=5e-2, rtol=5e-2), "bf16 kernel mismatch"

    # Larger batch exercising the multi-step (even, v7x dual-TC-friendly) grid.
    B2 = 2500
    x2 = jax.random.normal(k_x2, (B2, S), dtype=jnp.float32)
    ref2 = reference_forward(x2, params)
    out2 = jax.block_until_ready(
        critic_forward(x2, params, single_step_max=1024, target_tile=2048))
    assert out2.shape == (B2, 1), out2.shape
    assert jnp.allclose(out2, ref2, atol=2e-3, rtol=2e-3), "multi-step mismatch"

    # TODO(synk): dropout1/dropout2 are defined in __init__ but never used in
    # forward(), so they are intentionally not implemented.

    print("KERNEL_OK")
</pallas_src>

<mosaic_0001>
module attributes {stable_mosaic.version = 11 : i64} {
  func.func @critic_kernel(%arg0: i32, %arg1: memref<3xf32, #tpu.memory_space<smem>>, %arg2: memref<504x32xf32, #tpu.memory_space<vmem>>, %arg3: memref<32x128xf32, #tpu.memory_space<vmem>>, %arg4: memref<1x128xf32, #tpu.memory_space<vmem>>, %arg5: memref<128x128xf32, #tpu.memory_space<vmem>>, %arg6: memref<1x128xf32, #tpu.memory_space<vmem>>, %arg7: memref<128x1xf32, #tpu.memory_space<vmem>>, %arg8: memref<504x1xf32, #tpu.memory_space<vmem>>) attributes {dimension_semantics = [#tpu.dimension_semantics<parallel>], iteration_bounds = array<i64: 1>, scalar_prefetch = 0 : i64, scratch_operands = 0 : i64, tpu.core_type = #tpu.core_type<tc>, window_params = [{transform_indices = @transform_0, window_bounds = array<i64: 3>}, {transform_indices = @transform_1, window_bounds = array<i64: 504, 32>}, {pipeline_mode = #tpu.pipeline_mode<synchronous>, transform_indices = @transform_2, window_bounds = array<i64: 32, 128>}, {pipeline_mode = #tpu.pipeline_mode<synchronous>, transform_indices = @transform_3, window_bounds = array<i64: 1, 128>}, {pipeline_mode = #tpu.pipeline_mode<synchronous>, transform_indices = @transform_4, window_bounds = array<i64: 128, 128>}, {pipeline_mode = #tpu.pipeline_mode<synchronous>, transform_indices = @transform_5, window_bounds = array<i64: 1, 128>}, {pipeline_mode = #tpu.pipeline_mode<synchronous>, transform_indices = @transform_6, window_bounds = array<i64: 128, 1>}, {transform_indices = @transform_7, window_bounds = array<i64: 504, 1>}]} {
    %c0 = arith.constant 0 : index
    %0 = memref.load %arg1[%c0] : memref<3xf32, #tpu.memory_space<smem>>
    %c1 = arith.constant 1 : index
    %1 = memref.load %arg1[%c1] : memref<3xf32, #tpu.memory_space<smem>>
    %c2 = arith.constant 2 : index
    %2 = memref.load %arg1[%c2] : memref<3xf32, #tpu.memory_space<smem>>
    %c0_0 = arith.constant 0 : index
    %c0_1 = arith.constant 0 : index
    %3 = vector.load %arg2[%c0_0, %c0_1] : memref<504x32xf32, #tpu.memory_space<vmem>>, vector<504x32xf32>
    %c0_2 = arith.constant 0 : index
    %c0_3 = arith.constant 0 : index
    %4 = vector.load %arg3[%c0_2, %c0_3] : memref<32x128xf32, #tpu.memory_space<vmem>>, vector<32x128xf32>
    %cst = arith.constant dense<0.000000e+00> : vector<504x128xf32>
    %5 = tpu.matmul %3, %4, %cst {dimension_numbers = #tpu.dot_dimension_numbers<[1], [0], [0], [1], [0, 0, 1, 1], [], []>} : vector<504x32xf32>, vector<32x128xf32>, vector<504x128xf32> -> vector<504x128xf32>
    %c0_4 = arith.constant 0 : index
    %c0_5 = arith.constant 0 : index
    %6 = vector.load %arg4[%c0_4, %c0_5] : memref<1x128xf32, #tpu.memory_space<vmem>>, vector<1x128xf32>
    %7 = vector.broadcast %6 : vector<1x128xf32> to vector<504x128xf32>
    %8 = arith.addf %5, %7 : vector<504x128xf32>
    %cst_6 = arith.constant 0.000000e+00 : f32
    %9 = vector.broadcast %cst_6 : f32 to vector<504x128xf32>
    %10 = arith.cmpf ogt, %8, %9 : vector<504x128xf32>
    %11 = vector.broadcast %0 : f32 to vector<504x128xf32>
    %12 = arith.mulf %11, %8 : vector<504x128xf32>
    %13 = arith.select %10, %8, %12 : vector<504x128xi1>, vector<504x128xf32>
    %c0_7 = arith.constant 0 : index
    %c0_8 = arith.constant 0 : index
    %14 = vector.load %arg5[%c0_7, %c0_8] : memref<128x128xf32, #tpu.memory_space<vmem>>, vector<128x128xf32>
    %cst_9 = arith.constant dense<0.000000e+00> : vector<504x128xf32>
    %15 = tpu.matmul %13, %14, %cst_9 {dimension_numbers = #tpu.dot_dimension_numbers<[1], [0], [0], [1], [0, 0, 1, 1], [], []>} : vector<504x128xf32>, vector<128x128xf32>, vector<504x128xf32> -> vector<504x128xf32>
    %c0_10 = arith.constant 0 : index
    %c0_11 = arith.constant 0 : index
    %16 = vector.load %arg6[%c0_10, %c0_11] : memref<1x128xf32, #tpu.memory_space<vmem>>, vector<1x128xf32>
    %17 = vector.broadcast %16 : vector<1x128xf32> to vector<504x128xf32>
    %18 = arith.addf %15, %17 : vector<504x128xf32>
    %cst_12 = arith.constant 0.000000e+00 : f32
    %19 = vector.broadcast %cst_12 : f32 to vector<504x128xf32>
    %20 = arith.cmpf ogt, %18, %19 : vector<504x128xf32>
    %21 = vector.broadcast %1 : f32 to vector<504x128xf32>
    %22 = arith.mulf %21, %18 : vector<504x128xf32>
    %23 = arith.select %20, %18, %22 : vector<504x128xi1>, vector<504x128xf32>
    %c0_13 = arith.constant 0 : index
    %c0_14 = arith.constant 0 : index
    %24 = vector.load %arg7[%c0_13, %c0_14] : memref<128x1xf32, #tpu.memory_space<vmem>>, vector<128x1xf32>
    %cst_15 = arith.constant dense<0.000000e+00> : vector<504x1xf32>
    %25 = tpu.matmul %23, %24, %cst_15 {dimension_numbers = #tpu.dot_dimension_numbers<[1], [0], [0], [1], [0, 0, 1, 1], [], []>} : vector<504x128xf32>, vector<128x1xf32>, vector<504x1xf32> -> vector<504x1xf32>
    %26 = vector.broadcast %2 : f32 to vector<504x1xf32>
    %27 = arith.addf %25, %26 : vector<504x1xf32>
    %c0_16 = arith.constant 0 : index
    %c0_17 = arith.constant 0 : index
    %28 = vector.load %arg8[%c0_16, %c0_17] : memref<504x1xf32, #tpu.memory_space<vmem>>, vector<504x1xf32>
    tpu.vector_store %arg8[%c0_16, %c0_17], %27 {strides = array<i32>} : memref<504x1xf32, #tpu.memory_space<vmem>>, vector<504x1xf32>,
    return
  }
  func.func @transform_0(%arg0: i32) -> i32 {
    %c0_i32 = arith.constant 0 : i32
    %c0_i32_0 = arith.constant 0 : i32
    return %c0_i32 : i32
  }
  func.func @transform_1(%arg0: i32) -> (i32, i32) {
    %c0_i32 = arith.constant 0 : i32
    %c0_i32_0 = arith.constant 0 : i32
    return %arg0, %c0_i32 : i32, i32
  }
  func.func @transform_2(%arg0: i32) -> (i32, i32) {
    %c0_i32 = arith.constant 0 : i32
    %c0_i32_0 = arith.constant 0 : i32
    %c0_i32_1 = arith.constant 0 : i32
    return %c0_i32, %c0_i32_0 : i32, i32
  }
  func.func @transform_3(%arg0: i32) -> (i32, i32) {
    %c0_i32 = arith.constant 0 : i32
    %c0_i32_0 = arith.constant 0 : i32
    %c0_i32_1 = arith.constant 0 : i32
    return %c0_i32, %c0_i32_0 : i32, i32
  }
  func.func @transform_4(%arg0: i32) -> (i32, i32) {
    %c0_i32 = arith.constant 0 : i32
    %c0_i32_0 = arith.constant 0 : i32
    %c0_i32_1 = arith.constant 0 : i32
    return %c0_i32, %c0_i32_0 : i32, i32
  }
  func.func @transform_5(%arg0: i32) -> (i32, i32) {
    %c0_i32 = arith.constant 0 : i32
    %c0_i32_0 = arith.constant 0 : i32
    %c0_i32_1 = arith.constant 0 : i32
    return %c0_i32, %c0_i32_0 : i32, i32
  }
  func.func @transform_6(%arg0: i32) -> (i32, i32) {
    %c0_i32 = arith.constant 0 : i32
    %c0_i32_0 = arith.constant 0 : i32
    %c0_i32_1 = arith.constant 0 : i32
    return %c0_i32, %c0_i32_0 : i32, i32
  }
  func.func @transform_7(%arg0: i32) -> (i32, i32) {
    %c0_i32 = arith.constant 0 : i32
    %c0_i32_0 = arith.constant 0 : i32
    return %arg0, %c0_i32 : i32, i32
  }
}

</mosaic_0001>

<bundles_post_ra>
// kernel: tpu_custom_call.1
= control target key start
LH: loop header
LB: loop body
LE: loop exit
PB: predicated region body
PF: predicated region fallthrough
CT: control target
= control target key end

     0   :  { %12 = vsyncpa [#allocation3], 0  ;;  %s4428_s0 = inlined_call_operand.vmem [shape: f32[3], index: 0, kind: input, shape index: {}]   ;;  %s4429_s1 = inlined_call_operand.vmem [shape: f32[504,32], index: 1, kind: input, shape index: {}]   ;;  %s4430_s2 = inlined_call_operand.vmem [shape: f32[32,128], index: 2, kind: input, shape index: {}]   ;;  %s4431_s3 = inlined_call_operand.vmem [shape: f32[1,128], index: 3, kind: input, shape index: {}]   ;;  %s4432_s4 = inlined_call_operand.vmem [shape: f32[128,128], index: 4, kind: input, shape index: {}]   ;;  %s4433_s5 = inlined_call_operand.vmem [shape: f32[1,128], index: 5, kind: input, shape index: {}]   ;;  %s4434_s6 = inlined_call_operand.vmem [shape: f32[128,1], index: 6, kind: input, shape index: {}]   ;;  %s4435_s7 = inlined_call_operand.vmem [shape: f32[504,1], index: 7, kind: output, shape index: {}]  }
   0x1   :  { %s19_s26 = sshll.u32 %s4428_s0, 4  ;;  %s20_s26 = int_to_ptr.vmem [resolvable:$true] %s19_s26 }
   0x2   :  { %s2930_s27 = scalar_lea.vmem %s20_s26, 16  ;;  %p2935_p1 = scmp.lt.s32.totalorder %s20_s26, %s20_s26 }
   0x3   :  { %p2931_p0 = scmp.ne.s32.totalorder %s20_s26, %s2930_s27  ;;  %p2936_p2 = scmp.lt.s32.totalorder %s2930_s27, %s2930_s27 }
   0x5   :  { %p2937_p3 = por %p2936_p2, %p2935_p1 }
   0x7   :  { %p2938_p4 = pnand %p2937_p3, %p2931_p0 }
   0x9   :  { %2941 = shalt.err (!%p2938_p4)
}
   0xa   :  { %s2944_s28 = smov [#allocation2]  }
   0xb   :  { %22 = dma.vmem_to_smem %s20_s26, 16, %s2944_s28, [#allocation3]  }
   0xc   :  { %2942 = dma.done.wait [#allocation3], 16  }
   0xd   :  { %2943 = vsyncadd [#allocation3], 4294967280 }
   0xe   :  { %38 = sfence }
   0xf   :  { %v105_v0 = vld [vmem:[%s4430_s2] sm:$0xff]  ;;  %v106_v1 = vld [vmem:[%s4430_s2 + $0x8] sm:$0xff]  ;;  %v107_v2 = vld [vmem:[%s4430_s2 + $0x10] sm:$0xff]  ;;  %v2945_v3 = vmov 0.0|0.0   ;;  %vm2946_vm0 = vmmov 0   ;;  %v2947_v6 = vmov 0.0  }
  0x10   :  { %2866 = vmatprep.subr.bf16.mxu0 %v2945_v3  ;;  %v2867_v4 = vpack.c.bf16 %v106_v1, %v105_v0  ;;  %v108_v5 = vld [vmem:[%s4430_s2 + $0x18] sm:$0xff]  ;;  %2235 = vmatprep.mubr.msk.f32.mxu0 %vm2946_vm0, %v2947_v6  ;;  %v42_v8 = vld [vmem:[%s4429_s1] sm:$0xff]  ;;  %vm116_vm1 = vcmask 261120   ;;  %v877_v11 = vld [vmem:[%s4432_s4 + $0x8] sm:$0xff]  ;;  %s39_s23 = sld [smem:[#allocation2]] }
  0x11   :  { %2920 = vmatprep.subr.bf16.mxu1 %v2945_v3  ;;  %2331 = vmatprep.mubr.msk.f32.mxu1 %vm2946_vm0, %v2947_v6  ;;  %v2870_v7 = vpack.c.bf16 %v108_v5, %v107_v2  ;;  %v74_v9 = vld [vmem:[%s4429_s1 + $0x100] sm:$0xff]  ;;  %v43_v12 = vld [vmem:[%s4429_s1 + $0x8] sm:$0xff]  ;;  %v878_v15 = vld [vmem:[%s4432_s4 + $0x10] sm:$0xff] }
  0x12   :  { %2868 = vmatpush3.bf16.msra.mxu0 %v2867_v4  ;;  %2922 = vmatpush3.bf16.msra.mxu1 %v2867_v4  ;;  %v876_v10 = vld [vmem:[%s4432_s4] sm:$0xff]  ;;  %v75_v14 = vld [vmem:[%s4429_s1 + $0x108] sm:$0xff]  ;;  %v879_v16 = vld [vmem:[%s4432_s4 + $0x18] sm:$0xff] }
  0x13   :  { %2869 = vmatprep.subr.bf16.mxu0 %v2945_v3  ;;  %2921 = vmatprep.subr.bf16.mxu1 %v2945_v3  ;;  %v2873_v13 = vpack.c.bf16 %v877_v11, %v876_v10  ;;  %v2876_v17 = vpack.c.bf16 %v879_v16, %v878_v15  ;;  %v44_v18 = vld [vmem:[%s4429_s1 + $0x10] sm:$0xff]  ;;  %v880_v20 = vld [vmem:[%s4432_s4 + $0x20] sm:$0xff]  ;;  %v881_v21 = vld [vmem:[%s4432_s4 + $0x28] sm:$0xff] }
  0x14   :  { %v76_v19 = vld [vmem:[%s4429_s1 + $0x110] sm:$0xff]  ;;  %v2879_v22 = vpack.c.bf16 %v881_v21, %v880_v20  ;;  %v883_v24 = vld [vmem:[%s4432_s4 + $0x38] sm:$0xff]  ;;  %v884_v28 = vld [vmem:[%s4432_s4 + $0x40] sm:$0xff] }
  0x15   :  { %v882_v23 = vld [vmem:[%s4432_s4 + $0x30] sm:$0xff]  ;;  %v45_v25 = vld [vmem:[%s4429_s1 + $0x18] sm:$0xff]  ;;  %v885_v29 = vld [vmem:[%s4432_s4 + $0x48] sm:$0xff] }
  0x16   :  { %2871 = vmatpush3.bf16.msra.mxu0 %v2870_v7  ;;  %2923 = vmatpush3.bf16.msra.mxu1 %v2870_v7  ;;  %v77_v26 = vld [vmem:[%s4429_s1 + $0x118] sm:$0xff]  ;;  %v2882_v27 = vpack.c.bf16 %v883_v24, %v882_v23  ;;  %v46_v30 = vld [vmem:[%s4429_s1 + $0x20] sm:$0xff]  ;;  %v2885_v32 = vpack.c.bf16 %v885_v29, %v884_v28  ;;  %v886_v33 = vld [vmem:[%s4432_s4 + $0x50] sm:$0xff] }
  0x17   :  { %2872 = vmatprep.subr.bf16.mxu1 %v2945_v3  ;;  %2896 = vmatprep.subr.bf16.mxu0 %v2945_v3  ;;  %v78_v31 = vld [vmem:[%s4429_s1 + $0x120] sm:$0xff]  ;;  %v887_v34 = vld [vmem:[%s4432_s4 + $0x58] sm:$0xff]  ;;  %v47_v35 = vld [vmem:[%s4429_s1 + $0x28] sm:$0xff] }
  0x18   :  { %v79_v36 = vld [vmem:[%s4429_s1 + $0x128] sm:$0xff]  ;;  %v2888_v37 = vpack.c.bf16 %v887_v34, %v886_v33  ;;  %v888_v38 = vld [vmem:[%s4432_s4 + $0x60] sm:$0xff]  ;;  %v48_v40 = vld [vmem:[%s4429_s1 + $0x30] sm:$0xff] }
  0x19   :  { %2236 = vmatmul.mubr.msk.f32.vlgmr.msra.gmra.mrb[0].mxu0 %vm116_vm1, %v42_v8  ;;  %2332 = vmatmul.mubr.msk.f32.vlgmr.msra.gmra.mrb[0].mxu1 %vm116_vm1, %v74_v9  ;;  %v889_v39 = vld [vmem:[%s4432_s4 + $0x68] sm:$0xff]  ;;  %v80_v41 = vld [vmem:[%s4429_s1 + $0x130] sm:$0xff]  ;;  %v891_v44 = vld [vmem:[%s4432_s4 + $0x78] sm:$0xff] }
  0x1a   :  { %2238 = vmatprep.mubr.msk.f32.mxu0 %vm2946_vm0, %v2947_v6  ;;  %2334 = vmatprep.mubr.msk.f32.mxu1 %vm2946_vm0, %v2947_v6  ;;  %v2891_v42 = vpack.c.bf16 %v889_v39, %v888_v38  ;;  %v890_v43 = vld [vmem:[%s4432_s4 + $0x70] sm:$0xff]  ;;  %v49_v45 = vld [vmem:[%s4429_s1 + $0x38] sm:$0xff]  ;;  %v50_v48 = vld [vmem:[%s4429_s1 + $0x40] sm:$0xff] }
  0x1b   :  { %2874 = vmatpush3.bf16.msra.mxu1 %v2873_v13  ;;  %v81_v46 = vld [vmem:[%s4429_s1 + $0x138] sm:$0xff]  ;;  %v2894_v47 = vpack.c.bf16 %v891_v44, %v890_v43  ;;  %v82_v49 = vld [vmem:[%s4429_s1 + $0x140] sm:$0xff]  ;;  %v51_v50 = vld [vmem:[%s4429_s1 + $0x48] sm:$0xff]  ;;  %v3471_v43 = vstv %s39_s23 }
  0x1c   :  { %2875 = vmatprep.subr.bf16.mxu1 %v2945_v3  ;;  %v83_v51 = vld [vmem:[%s4429_s1 + $0x148] sm:$0xff]  ;;  %v52_v52 = vld [vmem:[%s4429_s1 + $0x50] sm:$0xff]  ;;  %v53_v54 = vld [vmem:[%s4429_s1 + $0x58] sm:$0xff] }
  0x1d   :  { %2239 = vmatmul.mubr.msk.f32.gmra.mrb[2].mxu0 %vm116_vm1, %v43_v12  ;;  %2335 = vmatmul.mubr.msk.f32.gmra.mrb[2].mxu1 %vm116_vm1, %v75_v14  ;;  %v84_v53 = vld [vmem:[%s4429_s1 + $0x150] sm:$0xff]  ;;  %v85_v55 = vld [vmem:[%s4429_s1 + $0x158] sm:$0xff]  ;;  %v54_v56 = vld [vmem:[%s4429_s1 + $0x60] sm:$0xff] }
  0x1e   :  { %2241 = vmatprep.mubr.msk.f32.mxu0 %vm2946_vm0, %v2947_v6  ;;  %2337 = vmatprep.mubr.msk.f32.mxu1 %vm2946_vm0, %v2947_v6  ;;  %v86_v57 = vld [vmem:[%s4429_s1 + $0x160] sm:$0xff]  ;;  %v55_v58 = vld [vmem:[%s4429_s1 + $0x68] sm:$0xff]  ;;  %v56_v60 = vld [vmem:[%s4429_s1 + $0x70] sm:$0xff] }
  0x1f   :  { %2877 = vmatpush3.bf16.msra.mxu1 %v2876_v17  ;;  %v87_v59 = vld [vmem:[%s4429_s1 + $0x168] sm:$0xff]  ;;  %v88_v61 = vld [vmem:[%s4429_s1 + $0x170] sm:$0xff]  ;;  %v57_v62 = vld [vmem:[%s4429_s1 + $0x78] sm:$0xff] }
  0x20   :  { %2878 = vmatprep.subr.bf16.mxu1 %v2945_v3  ;;  %v89_v63 = vld [vmem:[%s4429_s1 + $0x178] sm:$0xff]  ;;  %v58_v0 = vld [vmem:[%s4429_s1 + $0x80] sm:$0xff]  ;;  %v59_v2 = vld [vmem:[%s4429_s1 + $0x88] sm:$0xff] }
  0x21   :  { %2242 = vmatmul.mubr.msk.f32.gmra.mrb[4].mxu0 %vm116_vm1, %v44_v18  ;;  %2338 = vmatmul.mubr.msk.f32.gmra.mrb[4].mxu1 %vm116_vm1, %v76_v19  ;;  %v90_v1 = vld [vmem:[%s4429_s1 + $0x180] sm:$0xff]  ;;  %v91_v4 = vld [vmem:[%s4429_s1 + $0x188] sm:$0xff]  ;;  %v60_v5 = vld [vmem:[%s4429_s1 + $0x90] sm:$0xff] }
  0x22   :  { %2244 = vmatprep.mubr.msk.f32.mxu0 %vm2946_vm0, %v2947_v6  ;;  %2340 = vmatprep.mubr.msk.f32.mxu1 %vm2946_vm0, %v2947_v6  ;;  %v92_v7 = vld [vmem:[%s4429_s1 + $0x190] sm:$0xff]  ;;  %v61_v8 = vld [vmem:[%s4429_s1 + $0x98] sm:$0xff]  ;;  %v62_v10 = vld [vmem:[%s4429_s1 + $0xa0] sm:$0xff] }
  0x23   :  { %2880 = vmatpush3.bf16.msra.mxu1 %v2879_v22  ;;  %v93_v9 = vld [vmem:[%s4429_s1 + $0x198] sm:$0xff]  ;;  %v94_v11 = vld [vmem:[%s4429_s1 + $0x1a0] sm:$0xff]  ;;  %v63_v12 = vld [vmem:[%s4429_s1 + $0xa8] sm:$0xff] }
  0x24   :  { %2881 = vmatprep.subr.bf16.mxu1 %v2945_v3  ;;  %v95_v13 = vld [vmem:[%s4429_s1 + $0x1a8] sm:$0xff]  ;;  %v64_v14 = vld [vmem:[%s4429_s1 + $0xb0] sm:$0xff]  ;;  %v65_v16 = vld [vmem:[%s4429_s1 + $0xb8] sm:$0xff] }
  0x25   :  { %2245 = vmatmul.mubr.msk.f32.gmra.mrb[6].mxu0 %vm116_vm1, %v45_v25  ;;  %2341 = vmatmul.mubr.msk.f32.gmra.mrb[6].mxu1 %vm116_vm1, %v77_v26  ;;  %v96_v15 = vld [vmem:[%s4429_s1 + $0x1b0] sm:$0xff]  ;;  %v97_v17 = vld [vmem:[%s4429_s1 + $0x1b8] sm:$0xff]  ;;  %v66_v18 = vld [vmem:[%s4429_s1 + $0xc0] sm:$0xff] }
  0x26   :  { %2247 = vmatprep.mubr.msk.f32.mxu0 %vm2946_vm0, %v2947_v6  ;;  %2343 = vmatprep.mubr.msk.f32.mxu1 %vm2946_vm0, %v2947_v6  ;;  %v98_v19 = vld [vmem:[%s4429_s1 + $0x1c0] sm:$0xff]  ;;  %v67_v20 = vld [vmem:[%s4429_s1 + $0xc8] sm:$0xff]  ;;  %v68_v22 = vld [vmem:[%s4429_s1 + $0xd0] sm:$0xff] }
  0x27   :  { %2883 = vmatpush3.bf16.msra.mxu1 %v2882_v27  ;;  %v99_v21 = vld [vmem:[%s4429_s1 + $0x1c8] sm:$0xff]  ;;  %v100_v23 = vld [vmem:[%s4429_s1 + $0x1d0] sm:$0xff]  ;;  %v69_v24 = vld [vmem:[%s4429_s1 + $0xd8] sm:$0xff] }
  0x28   :  { %2884 = vmatprep.subr.bf16.mxu1 %v2945_v3  ;;  %v101_v25 = vld [vmem:[%s4429_s1 + $0x1d8] sm:$0xff]  ;;  %v70_v26 = vld [vmem:[%s4429_s1 + $0xe0] sm:$0xff]  ;;  %v71_v28 = vld [vmem:[%s4429_s1 + $0xe8] sm:$0xff] }
  0x29   :  { %2248 = vmatmul.mubr.msk.f32.gmra.mrb[8].mxu0 %vm116_vm1, %v46_v30  ;;  %2344 = vmatmul.mubr.msk.f32.gmra.mrb[8].mxu1 %vm116_vm1, %v78_v31  ;;  %v102_v27 = vld [vmem:[%s4429_s1 + $0x1e0] sm:$0xff]  ;;  %v103_v29 = vld [vmem:[%s4429_s1 + $0x1e8] sm:$0xff]  ;;  %v72_v30 = vld [vmem:[%s4429_s1 + $0xf0] sm:$0xff] }
  0x2a   :  { %2250 = vmatprep.mubr.msk.f32.mxu0 %vm2946_vm0, %v2947_v6  ;;  %2346 = vmatprep.mubr.msk.f32.mxu1 %vm2946_vm0, %v2947_v6  ;;  %v104_v31 = vld [vmem:[%s4429_s1 + $0x1f0] sm:$0xff]  ;;  %v1469_v33 = vld [vmem:[%s4434_s6] sm:$0xff]  ;;  %v1470_v34 = vld [vmem:[%s4434_s6 + $0x8] sm:$0xff] }
  0x2b   :  { %2886 = vmatpush3.bf16.msra.mxu1 %v2885_v32  ;;  %v73_v32 = vld [vmem:[%s4429_s1 + $0xf8] sm:$0xff]  ;;  %v3463_v39 = vld [vmem:[%s4431_s3] ss:$0 sm:$0xff] }
  0x2c   :  { %2887 = vmatprep.subr.bf16.mxu1 %v2945_v3 }
  0x2d   :  { %2251 = vmatmul.mubr.msk.f32.gmra.mrb[10].mxu0 %vm116_vm1, %v47_v35  ;;  %2347 = vmatmul.mubr.msk.f32.gmra.mrb[10].mxu1 %vm116_vm1, %v79_v36  ;;  %v2897_v35 = vpack.c.bf16 %v1470_v34, %v1469_v33  ;;  %v1471_v36 = vld [vmem:[%s4434_s6 + $0x10] sm:$0xff] }
  0x2e   :  { %2253 = vmatprep.mubr.msk.f32.mxu0 %vm2946_vm0, %v2947_v6  ;;  %2349 = vmatprep.mubr.msk.f32.mxu1 %vm2946_vm0, %v2947_v6 }
  0x2f   :  { %2889 = vmatpush3.bf16.msra.mxu1 %v2888_v37  ;;  %2898 = vmatpush3.bf16.msra.mxu0 %v2897_v35  ;;  %v1472_v37 = vld [vmem:[%s4434_s6 + $0x18] sm:$0xff] }
  0x30   :  { %2890 = vmatprep.subr.bf16.mxu1 %v2945_v3  ;;  %2899 = vmatprep.subr.bf16.mxu0 %v2945_v3  ;;  %v2900_v38 = vpack.c.bf16 %v1472_v37, %v1471_v36 }
  0x31   :  { %2254 = vmatmul.mubr.msk.f32.gmra.mrb[12].mxu0 %vm116_vm1, %v48_v40  ;;  %2350 = vmatmul.mubr.msk.f32.gmra.mrb[12].mxu1 %vm116_vm1, %v80_v41  ;;  %v1473_v40 = vld [vmem:[%s4434_s6 + $0x20] sm:$0xff]  ;;  %v1474_v41 = vld [vmem:[%s4434_s6 + $0x28] sm:$0xff] }
  0x32   :  { %2256 = vmatprep.mubr.msk.f32.mxu0 %vm2946_vm0, %v2947_v6  ;;  %2352 = vmatprep.mubr.msk.f32.mxu1 %vm2946_vm0, %v2947_v6 }
  0x33   :  { %2892 = vmatpush3.bf16.msra.mxu1 %v2891_v42  ;;  %2901 = vmatpush3.bf16.msra.mxu0 %v2900_v38 }
  0x34   :  { %2893 = vmatprep.subr.bf16.mxu1 %v2945_v3  ;;  %2902 = vmatprep.subr.bf16.mxu0 %v2945_v3 }
  0x35   :  { %2257 = vmatmul.mubr.msk.f32.gmra.mrb[14].mxu0 %vm116_vm1, %v49_v45  ;;  %2353 = vmatmul.mubr.msk.f32.gmra.mrb[14].mxu1 %vm116_vm1, %v81_v46  ;;  %v2903_v45 = vpack.c.bf16 %v1474_v41, %v1473_v40  ;;  %v1477_v40 = vld [vmem:[%s4434_s6 + $0x40] sm:$0xff]  ;;  %v1478_v41 = vld [vmem:[%s4434_s6 + $0x48] sm:$0xff] }
  0x36   :  { %2259 = vmatprep.mubr.msk.f32.mxu0 %vm2946_vm0, %v2947_v6  ;;  %2355 = vmatprep.mubr.msk.f32.mxu1 %vm2946_vm0, %v2947_v6 }
  0x37   :  { %2895 = vmatpush3.bf16.msra.mxu1 %v2894_v47  ;;  %2904 = vmatpush3.bf16.msra.mxu0 %v2903_v45  ;;  %v2909_v45 = vpack.c.bf16 %v1478_v41, %v1477_v40 }
  0x38   :  { %2905 = vmatprep.subr.bf16.mxu0 %v2945_v3 }
  0x39   :  { %2260 = vmatmul.mubr.msk.f32.gmra.mrb[16].mxu0 %vm116_vm1, %v50_v48  ;;  %2356 = vmatmul.mubr.msk.f32.gmra.mrb[16].mxu1 %vm116_vm1, %v82_v49 }
  0x3a   :  { %2262 = vmatprep.mubr.msk.f32.mxu0 %vm2946_vm0, %v2947_v6  ;;  %2358 = vmatprep.mubr.msk.f32.mxu1 %vm2946_vm0, %v2947_v6 }
  0x3d   :  { %2263 = vmatmul.mubr.msk.f32.gmra.mrb[18].mxu0 %vm116_vm1, %v51_v50  ;;  %2359 = vmatmul.mubr.msk.f32.gmra.mrb[18].mxu1 %vm116_vm1, %v83_v51 }
  0x3e   :  { %2265 = vmatprep.mubr.msk.f32.mxu0 %vm2946_vm0, %v2947_v6  ;;  %2361 = vmatprep.mubr.msk.f32.mxu1 %vm2946_vm0, %v2947_v6 }
  0x41   :  { %2266 = vmatmul.mubr.msk.f32.gmra.mrb[20].mxu0 %vm116_vm1, %v52_v52  ;;  %2362 = vmatmul.mubr.msk.f32.gmra.mrb[20].mxu1 %vm116_vm1, %v84_v53 }
  0x42   :  { %2268 = vmatprep.mubr.msk.f32.mxu0 %vm2946_vm0, %v2947_v6  ;;  %2364 = vmatprep.mubr.msk.f32.mxu1 %vm2946_vm0, %v2947_v6 }
  0x45   :  { %2269 = vmatmul.mubr.msk.f32.gmra.mrb[22].mxu0 %vm116_vm1, %v53_v54  ;;  %2365 = vmatmul.mubr.msk.f32.gmra.mrb[22].mxu1 %vm116_vm1, %v85_v55 }
  0x46   :  { %2271 = vmatprep.mubr.msk.f32.mxu0 %vm2946_vm0, %v2947_v6  ;;  %2367 = vmatprep.mubr.msk.f32.mxu1 %vm2946_vm0, %v2947_v6 }
  0x49   :  { %2272 = vmatmul.mubr.msk.f32.gmra.mrb[24].mxu0 %vm116_vm1, %v54_v56  ;;  %2368 = vmatmul.mubr.msk.f32.gmra.mrb[24].mxu1 %vm116_vm1, %v86_v57 }
  0x4a   :  { %2274 = vmatprep.mubr.msk.f32.mxu0 %vm2946_vm0, %v2947_v6  ;;  %2370 = vmatprep.mubr.msk.f32.mxu1 %vm2946_vm0, %v2947_v6 }
  0x4d   :  { %2275 = vmatmul.mubr.msk.f32.gmra.mrb[26].mxu0 %vm116_vm1, %v55_v58  ;;  %2371 = vmatmul.mubr.msk.f32.gmra.mrb[26].mxu1 %vm116_vm1, %v87_v59 }
  0x4e   :  { %2277 = vmatprep.mubr.msk.f32.mxu0 %vm2946_vm0, %v2947_v6  ;;  %2373 = vmatprep.mubr.msk.f32.mxu1 %vm2946_vm0, %v2947_v6 }
  0x51   :  { %2278 = vmatmul.mubr.msk.f32.gmra.mrb[28].mxu0 %vm116_vm1, %v56_v60  ;;  %2374 = vmatmul.mubr.msk.f32.gmra.mrb[28].mxu1 %vm116_vm1, %v88_v61 }
  0x52   :  { %2280 = vmatprep.mubr.msk.f32.mxu0 %vm2946_vm0, %v2947_v6  ;;  %2376 = vmatprep.mubr.msk.f32.mxu1 %vm2946_vm0, %v2947_v6 }
  0x55   :  { %2281 = vmatmul.mubr.msk.f32.gmra.mrb[30].mxu0 %vm116_vm1, %v57_v62  ;;  %2377 = vmatmul.mubr.msk.f32.gmra.mrb[30].mxu1 %vm116_vm1, %v89_v63 }
  0x56   :  { %2283 = vmatprep.mubr.msk.f32.mxu0 %vm2946_vm0, %v2947_v6  ;;  %2379 = vmatprep.mubr.msk.f32.mxu1 %vm2946_vm0, %v2947_v6 }
  0x59   :  { %2284 = vmatmul.mubr.msk.f32.gmra.mrb[32].mxu0 %vm116_vm1, %v58_v0  ;;  %2380 = vmatmul.mubr.msk.f32.gmra.mrb[32].mxu1 %vm116_vm1, %v90_v1 }
  0x5a   :  { %2286 = vmatprep.mubr.msk.f32.mxu0 %vm2946_vm0, %v2947_v6  ;;  %2382 = vmatprep.mubr.msk.f32.mxu1 %vm2946_vm0, %v2947_v6 }
  0x5d   :  { %2287 = vmatmul.mubr.msk.f32.gmra.mrb[34].mxu0 %vm116_vm1, %v59_v2  ;;  %2383 = vmatmul.mubr.msk.f32.gmra.mrb[34].mxu1 %vm116_vm1, %v91_v4 }
  0x5e   :  { %2289 = vmatprep.mubr.msk.f32.mxu0 %vm2946_vm0, %v2947_v6  ;;  %2385 = vmatprep.mubr.msk.f32.mxu1 %vm2946_vm0, %v2947_v6 }
  0x61   :  { %2290 = vmatmul.mubr.msk.f32.gmra.mrb[36].mxu0 %vm116_vm1, %v60_v5  ;;  %2386 = vmatmul.mubr.msk.f32.gmra.mrb[36].mxu1 %vm116_vm1, %v92_v7 }
  0x62   :  { %2292 = vmatprep.mubr.msk.f32.mxu0 %vm2946_vm0, %v2947_v6  ;;  %2388 = vmatprep.mubr.msk.f32.mxu1 %vm2946_vm0, %v2947_v6 }
  0x65   :  { %2293 = vmatmul.mubr.msk.f32.gmra.mrb[38].mxu0 %vm116_vm1, %v61_v8  ;;  %2389 = vmatmul.mubr.msk.f32.gmra.mrb[38].mxu1 %vm116_vm1, %v93_v9  ;;  %v1475_v8 = vld [vmem:[%s4434_s6 + $0x30] sm:$0xff]  ;;  %v1476_v9 = vld [vmem:[%s4434_s6 + $0x38] sm:$0xff] }
  0x66   :  { %2295 = vmatprep.mubr.msk.f32.mxu0 %vm2946_vm0, %v2947_v6  ;;  %2391 = vmatprep.mubr.msk.f32.mxu1 %vm2946_vm0, %v2947_v6 }
  0x69   :  { %2296 = vmatmul.mubr.msk.f32.gmra.mrb[40].mxu0 %vm116_vm1, %v62_v10  ;;  %2392 = vmatmul.mubr.msk.f32.gmra.mrb[40].mxu1 %vm116_vm1, %v94_v11  ;;  %v2906_v11 = vpack.c.bf16 %v1476_v9, %v1475_v8 }
  0x6a   :  { %2298 = vmatprep.mubr.msk.f32.mxu0 %vm2946_vm0, %v2947_v6  ;;  %2394 = vmatprep.mubr.msk.f32.mxu1 %vm2946_vm0, %v2947_v6 }
  0x6b   :  { %2907 = vmatpush3.bf16.msra.mxu0 %v2906_v11 }
  0x6c   :  { %2908 = vmatprep.subr.bf16.mxu0 %v2945_v3 }
  0x6d   :  { %2299 = vmatmul.mubr.msk.f32.gmra.mrb[42].mxu0 %vm116_vm1, %v63_v12  ;;  %2395 = vmatmul.mubr.msk.f32.gmra.mrb[42].mxu1 %vm116_vm1, %v95_v13 }
  0x6e   :  { %2301 = vmatprep.mubr.msk.f32.mxu0 %vm2946_vm0, %v2947_v6  ;;  %2397 = vmatprep.mubr.msk.f32.mxu1 %vm2946_vm0, %v2947_v6 }
  0x6f   :  { %2910 = vmatpush3.bf16.msra.mxu0 %v2909_v45 }
  0x70   :  { %2911 = vmatprep.subr.bf16.mxu0 %v2945_v3 }
  0x71   :  { %2302 = vmatmul.mubr.msk.f32.gmra.mrb[44].mxu0 %vm116_vm1, %v64_v14  ;;  %2398 = vmatmul.mubr.msk.f32.gmra.mrb[44].mxu1 %vm116_vm1, %v96_v15 }
  0x72   :  { %2304 = vmatprep.mubr.msk.f32.mxu0 %vm2946_vm0, %v2947_v6  ;;  %2400 = vmatprep.mubr.msk.f32.mxu1 %vm2946_vm0, %v2947_v6 }
  0x75   :  { %2305 = vmatmul.mubr.msk.f32.gmra.mrb[46].mxu0 %vm116_vm1, %v65_v16  ;;  %2401 = vmatmul.mubr.msk.f32.gmra.mrb[46].mxu1 %vm116_vm1, %v97_v17 }
  0x76   :  { %2307 = vmatprep.mubr.msk.f32.mxu0 %vm2946_vm0, %v2947_v6  ;;  %2403 = vmatprep.mubr.msk.f32.mxu1 %vm2946_vm0, %v2947_v6 }
  0x79   :  { %2308 = vmatmul.mubr.msk.f32.gmra.mrb[48].mxu0 %vm116_vm1, %v66_v18  ;;  %2404 = vmatmul.mubr.msk.f32.gmra.mrb[48].mxu1 %vm116_vm1, %v98_v19 }
  0x7a   :  { %2310 = vmatprep.mubr.msk.f32.mxu0 %vm2946_vm0, %v2947_v6  ;;  %2406 = vmatprep.mubr.msk.f32.mxu1 %vm2946_vm0, %v2947_v6 }
  0x7d   :  { %2311 = vmatmul.mubr.msk.f32.gmra.mrb[50].mxu0 %vm116_vm1, %v67_v20  ;;  %2407 = vmatmul.mubr.msk.f32.gmra.mrb[50].mxu1 %vm116_vm1, %v99_v21 }
  0x7e   :  { %2313 = vmatprep.mubr.msk.f32.mxu0 %vm2946_vm0, %v2947_v6  ;;  %2409 = vmatprep.mubr.msk.f32.mxu1 %vm2946_vm0, %v2947_v6 }
  0x81   :  { %2314 = vmatmul.mubr.msk.f32.gmra.mrb[52].mxu0 %vm116_vm1, %v68_v22  ;;  %2410 = vmatmul.mubr.msk.f32.gmra.mrb[52].mxu1 %vm116_vm1, %v100_v23 }
  0x82   :  { %2316 = vmatprep.mubr.msk.f32.mxu0 %vm2946_vm0, %v2947_v6  ;;  %2412 = vmatprep.mubr.msk.f32.mxu1 %vm2946_vm0, %v2947_v6 }
  0x85   :  { %2317 = vmatmul.mubr.msk.f32.gmra.mrb[54].mxu0 %vm116_vm1, %v69_v24  ;;  %2413 = vmatmul.mubr.msk.f32.gmra.mrb[54].mxu1 %vm116_vm1, %v101_v25 }
  0x86   :  { %2319 = vmatprep.mubr.msk.f32.mxu0 %vm2946_vm0, %v2947_v6  ;;  %2415 = vmatprep.mubr.msk.f32.mxu1 %vm2946_vm0, %v2947_v6 }
  0x89   :  { %2320 = vmatmul.mubr.msk.f32.gmra.mrb[56].mxu0 %vm116_vm1, %v70_v26  ;;  %2416 = vmatmul.mubr.msk.f32.gmra.mrb[56].mxu1 %vm116_vm1, %v102_v27 }
  0x8a   :  { %2322 = vmatprep.mubr.msk.f32.mxu0 %vm2946_vm0, %v2947_v6  ;;  %2418 = vmatprep.mubr.msk.f32.mxu1 %vm2946_vm0, %v2947_v6 }
  0x8d   :  { %2323 = vmatmul.mubr.msk.f32.gmra.mrb[58].mxu0 %vm116_vm1, %v71_v28  ;;  %2419 = vmatmul.mubr.msk.f32.gmra.mrb[58].mxu1 %vm116_vm1, %v103_v29 }
  0x8e   :  { %2325 = vmatprep.mubr.msk.f32.mxu0 %vm2946_vm0, %v2947_v6  ;;  %2421 = vmatprep.mubr.msk.f32.mxu1 %vm2946_vm0, %v2947_v6 }
  0x91   :  { %2326 = vmatmul.mubr.msk.f32.gmra.mrb[60].mxu0 %vm116_vm1, %v72_v30  ;;  %2422 = vmatmul.mubr.msk.f32.gmra.mrb[60].mxu1 %vm116_vm1, %v104_v31 }
  0x92   :  { %2328 = vmatprep.mubr.msk.f32.mxu0 %vm2946_vm0, %v2947_v6  ;;  %2456 = vmatprep.mubr.msk.f32.mxu1 %vm2946_vm0, %v2947_v6 }
  0x95   :  { %2329 = vmatmul.mubr.msk.f32.gmra.mrb[62].mxu0 %vm116_vm1, %v73_v32 }
  0x96   :  { %2677 = vmatprep.mubr.msk.f32.mxu0 %vm2946_vm0, %v2947_v6 }
  0xec   :  { %v372_v42 = vpop.f32.mrb[0].mxu0  ;;  %v3473_v44 = vpop.f32.mrb[0].mxu1 }
  0xed   :  { %v373_v46 = vadd.f32 %v3463_v39, %v372_v42  ;;  %v2237_v47 = vpop.f32.mrb[1].mxu0  ;;  %v2333_v48 = vpop.f32.mrb[1].mxu1 }
  0xef   :  { %vm686_vm2 = vcmp.gt.f32.partialorder %v373_v46, 0.0  ;;  %v750_v49 = vmul.f32 %v3471_v43, %v373_v46 }
  0xf0   :  { %v377_v50 = vpop.f32.mrb[2].mxu0  ;;  %v3478_v51 = vpop.f32.mrb[2].mxu1 }
  0xf1   :  { %v813_v52 = vsel %vm686_vm2, %v373_v46, %v750_v49  ;;  %v378_v53 = vadd.f32 %v3463_v39, %v377_v50  ;;  %v2240_v54 = vpop.f32.mrb[3].mxu0  ;;  %v2336_v55 = vpop.f32.mrb[3].mxu1 }
  0xf2   :  { %2457 = vmatmul.mubr.f32.vlgmr.msra.gmra.mrb[62].mxu1 %v813_v52 }
  0xf3   :  { %v751_v56 = vmul.f32 %v3471_v43, %v378_v53  ;;  %2459 = vmatprep.mubr.msk.f32.mxu1 %vm2946_vm0, %v2947_v6  ;;  %vm687_vm3 = vcmp.gt.f32.partialorder %v378_v53, 0.0 }
  0xf4   :  { %v382_v57 = vpop.f32.mrb[4].mxu0  ;;  %v3484_v58 = vpop.f32.mrb[4].mxu1 }
  0xf5   :  { %v383_v59 = vadd.f32 %v3463_v39, %v382_v57  ;;  %v2243_v60 = vpop.f32.mrb[5].mxu0  ;;  %v814_v61 = vsel %vm687_vm3, %v378_v53, %v751_v56  ;;  %v2339_v62 = vpop.f32.mrb[5].mxu1 }
  0xf6   :  { %2460 = vmatmul.mubr.f32.gmra.mrb[64].mxu1 %v814_v61 }
  0xf7   :  { %v752_v63 = vmul.f32 %v3471_v43, %v383_v59  ;;  %2462 = vmatprep.mubr.msk.f32.mxu1 %vm2946_vm0, %v2947_v6  ;;  %vm688_vm4 = vcmp.gt.f32.partialorder %v383_v59, 0.0 }
  0xf8   :  { %v387_v0 = vpop.f32.mrb[6].mxu0  ;;  %v3490_v1 = vpop.f32.mrb[6].mxu1 }
  0xf9   :  { %v388_v2 = vadd.f32 %v3463_v39, %v387_v0  ;;  %v2246_v4 = vpop.f32.mrb[7].mxu0  ;;  %v815_v5 = vsel %vm688_vm4, %v383_v59, %v752_v63  ;;  %v2342_v7 = vpop.f32.mrb[7].mxu1 }
  0xfa   :  { %2463 = vmatmul.mubr.f32.gmra.mrb[66].mxu1 %v815_v5 }
  0xfb   :  { %v753_v10 = vmul.f32 %v3471_v43, %v388_v2  ;;  %2465 = vmatprep.mubr.msk.f32.mxu1 %vm2946_vm0, %v2947_v6  ;;  %vm689_vm5 = vcmp.gt.f32.partialorder %v388_v2, 0.0 }
  0xfc   :  { %v392_v12 = vpop.f32.mrb[8].mxu0  ;;  %v3502_v13 = vpop.f32.mrb[8].mxu1 }
  0xfd   :  { %v393_v14 = vadd.f32 %v3463_v39, %v392_v12  ;;  %v2249_v15 = vpop.f32.mrb[9].mxu0  ;;  %v816_v16 = vsel %vm689_vm5, %v388_v2, %v753_v10  ;;  %v2345_v17 = vpop.f32.mrb[9].mxu1 }
  0xfe   :  { %2466 = vmatmul.mubr.f32.gmra.mrb[68].mxu1 %v816_v16  ;;  %v1479_v15 = vld [vmem:[%s4434_s6 + $0x50] sm:$0xff]  ;;  %v1480_v16 = vld [vmem:[%s4434_s6 + $0x58] sm:$0xff] }
  0xff   :  { %v754_v18 = vmul.f32 %v3471_v43, %v393_v14  ;;  %2468 = vmatprep.mubr.msk.f32.mxu1 %vm2946_vm0, %v2947_v6  ;;  %vm690_vm6 = vcmp.gt.f32.partialorder %v393_v14, 0.0 }
 0x100   :  { %v397_v19 = vpop.f32.mrb[10].mxu0  ;;  %v3509_v20 = vpop.f32.mrb[10].mxu1 }
 0x101   :  { %v398_v21 = vadd.f32 %v3463_v39, %v397_v19  ;;  %v2252_v22 = vpop.f32.mrb[11].mxu0  ;;  %v817_v23 = vsel %vm690_vm6, %v393_v14, %v754_v18  ;;  %v2348_v24 = vpop.f32.mrb[11].mxu1  ;;  %v2912_v18 = vpack.c.bf16 %v1480_v16, %v1479_v15 }
 0x102   :  { %2469 = vmatmul.mubr.f32.gmra.mrb[70].mxu1 %v817_v23 }
 0x103   :  { %v755_v25 = vmul.f32 %v3471_v43, %v398_v21  ;;  %2471 = vmatprep.mubr.msk.f32.mxu1 %vm2946_vm0, %v2947_v6  ;;  %vm691_vm7 = vcmp.gt.f32.partialorder %v398_v21, 0.0  ;;  %2913 = vmatpush3.bf16.msra.mxu0 %v2912_v18 }
 0x104   :  { %v402_v26 = vpop.f32.mrb[12].mxu0  ;;  %v3515_v27 = vpop.f32.mrb[12].mxu1  ;;  %2914 = vmatprep.subr.bf16.mxu0 %v2945_v3 }
 0x105   :  { %v403_v28 = vadd.f32 %v3463_v39, %v402_v26  ;;  %v2255_v29 = vpop.f32.mrb[13].mxu0  ;;  %v818_v30 = vsel %vm691_vm7, %v398_v21, %v755_v25  ;;  %v2351_v31 = vpop.f32.mrb[13].mxu1 }
 0x106   :  { %2472 = vmatmul.mubr.f32.gmra.mrb[72].mxu1 %v818_v30 }
 0x107   :  { %v756_v32 = vmul.f32 %v3471_v43, %v403_v28  ;;  %2474 = vmatprep.mubr.msk.f32.mxu1 %vm2946_vm0, %v2947_v6  ;;  %vm692_vm8 = vcmp.gt.f32.partialorder %v403_v28, 0.0 }
 0x108   :  { %v407_v33 = vpop.f32.mrb[14].mxu0  ;;  %v3521_v34 = vpop.f32.mrb[14].mxu1 }
 0x109   :  { %v408_v35 = vadd.f32 %v3463_v39, %v407_v33  ;;  %v2258_v36 = vpop.f32.mrb[15].mxu0  ;;  %v819_v37 = vsel %vm692_vm8, %v403_v28, %v756_v32  ;;  %v2354_v38 = vpop.f32.mrb[15].mxu1 }
 0x10a   :  { %2475 = vmatmul.mubr.f32.gmra.mrb[74].mxu1 %v819_v37 }
 0x10b   :  { %v757_v42 = vmul.f32 %v3471_v43, %v408_v35  ;;  %2477 = vmatprep.mubr.msk.f32.mxu1 %vm2946_vm0, %v2947_v6  ;;  %vm693_vm9 = vcmp.gt.f32.partialorder %v408_v35, 0.0 }
 0x10c   :  { %v412_v46 = vpop.f32.mrb[16].mxu0  ;;  %v3533_v47 = vpop.f32.mrb[16].mxu1 }
 0x10d   :  { %v413_v48 = vadd.f32 %v3463_v39, %v412_v46  ;;  %v2261_v49 = vpop.f32.mrb[17].mxu0  ;;  %v820_v50 = vsel %vm693_vm9, %v408_v35, %v757_v42  ;;  %v2357_v52 = vpop.f32.mrb[17].mxu1 }
 0x10e   :  { %2478 = vmatmul.mubr.f32.gmra.mrb[76].mxu1 %v820_v50 }
 0x10f   :  { %v758_v53 = vmul.f32 %v3471_v43, %v413_v48  ;;  %2480 = vmatprep.mubr.msk.f32.mxu1 %vm2946_vm0, %v2947_v6  ;;  %vm694_vm10 = vcmp.gt.f32.partialorder %v413_v48, 0.0 }
 0x110   :  { %v417_v54 = vpop.f32.mrb[18].mxu0  ;;  %v3540_v55 = vpop.f32.mrb[18].mxu1 }
 0x111   :  { %v418_v56 = vadd.f32 %v3463_v39, %v417_v54  ;;  %v2264_v57 = vpop.f32.mrb[19].mxu0  ;;  %v821_v59 = vsel %vm694_vm10, %v413_v48, %v758_v53  ;;  %v2360_v60 = vpop.f32.mrb[19].mxu1  ;;  %v1481_v54 = vld [vmem:[%s4434_s6 + $0x60] sm:$0xff] }
 0x112   :  { %2481 = vmatmul.mubr.f32.gmra.mrb[78].mxu1 %v821_v59 }
 0x113   :  { %v759_v61 = vmul.f32 %v3471_v43, %v418_v56  ;;  %2483 = vmatprep.mubr.msk.f32.mxu1 %vm2946_vm0, %v2947_v6  ;;  %vm695_vm11 = vcmp.gt.f32.partialorder %v418_v56, 0.0 }
 0x114   :  { %v422_v62 = vpop.f32.mrb[20].mxu0  ;;  %v3546_v63 = vpop.f32.mrb[20].mxu1 }
 0x115   :  { %v423_v0 = vadd.f32 %v3463_v39, %v422_v62  ;;  %v2267_v2 = vpop.f32.mrb[21].mxu0  ;;  %v822_v4 = vsel %vm695_vm11, %v418_v56, %v759_v61  ;;  %v2363_v5 = vpop.f32.mrb[21].mxu1  ;;  %v1482_v56 = vld [vmem:[%s4434_s6 + $0x68] sm:$0xff] }
 0x116   :  { %2484 = vmatmul.mubr.f32.gmra.mrb[80].mxu1 %v822_v4  ;;  %v2915_v59 = vpack.c.bf16 %v1482_v56, %v1481_v54 }
 0x117   :  { %v760_v7 = vmul.f32 %v3471_v43, %v423_v0  ;;  %2486 = vmatprep.mubr.msk.f32.mxu1 %vm2946_vm0, %v2947_v6  ;;  %vm696_vm12 = vcmp.gt.f32.partialorder %v423_v0, 0.0 }
 0x118   :  { %v427_v8 = vpop.f32.mrb[22].mxu0  ;;  %v3552_v9 = vpop.f32.mrb[22].mxu1  ;;  %2916 = vmatpush3.bf16.msra.mxu0 %v2915_v59 }
 0x119   :  { %v428_v10 = vadd.f32 %v3463_v39, %v427_v8  ;;  %v2270_v11 = vpop.f32.mrb[23].mxu0  ;;  %v823_v12 = vsel %vm696_vm12, %v423_v0, %v760_v7  ;;  %v2366_v14 = vpop.f32.mrb[23].mxu1  ;;  %2917 = vmatprep.subr.bf16.mxu0 %v2945_v3 }
 0x11a   :  { %2487 = vmatmul.mubr.f32.gmra.mrb[82].mxu1 %v823_v12 }
 0x11b   :  { %v761_v17 = vmul.f32 %v3471_v43, %v428_v10  ;;  %2489 = vmatprep.mubr.msk.f32.mxu1 %vm2946_vm0, %v2947_v6  ;;  %vm697_vm13 = vcmp.gt.f32.partialorder %v428_v10, 0.0 }
 0x11c   :  { %v432_v19 = vpop.f32.mrb[24].mxu0  ;;  %v3564_v21 = vpop.f32.mrb[24].mxu1 }
 0x11d   :  { %v433_v22 = vadd.f32 %v3463_v39, %v432_v19  ;;  %v2273_v23 = vpop.f32.mrb[25].mxu0  ;;  %v824_v24 = vsel %vm697_vm13, %v428_v10, %v761_v17  ;;  %v2369_v25 = vpop.f32.mrb[25].mxu1 }
 0x11e   :  { %2490 = vmatmul.mubr.f32.gmra.mrb[84].mxu1 %v824_v24 }
 0x11f   :  { %v762_v26 = vmul.f32 %v3471_v43, %v433_v22  ;;  %2492 = vmatprep.mubr.msk.f32.mxu1 %vm2946_vm0, %v2947_v6  ;;  %vm698_vm14 = vcmp.gt.f32.partialorder %v433_v22, 0.0 }
 0x120   :  { %v437_v28 = vpop.f32.mrb[26].mxu0  ;;  %v3571_v29 = vpop.f32.mrb[26].mxu1 }
 0x121   :  { %v438_v30 = vadd.f32 %v3463_v39, %v437_v28  ;;  %v2276_v31 = vpop.f32.mrb[27].mxu0  ;;  %v825_v32 = vsel %vm698_vm14, %v433_v22, %v762_v26  ;;  %v2372_v33 = vpop.f32.mrb[27].mxu1 }
 0x122   :  { %2493 = vmatmul.mubr.f32.gmra.mrb[86].mxu1 %v825_v32  ;;  %v1483_v32 = vld [vmem:[%s4434_s6 + $0x70] sm:$0xff]  ;;  %v1484_v33 = vld [vmem:[%s4434_s6 + $0x78] sm:$0xff]  ;;  %s1935_s6 = sld [smem:[#allocation2 + $0x1]] }
 0x123   :  { %v763_v35 = vmul.f32 %v3471_v43, %v438_v30  ;;  %2495 = vmatprep.mubr.msk.f32.mxu1 %vm2946_vm0, %v2947_v6  ;;  %vm699_vm15 = vcmp.gt.f32.partialorder %v438_v30, 0.0 }
 0x124   :  { %v442_v36 = vpop.f32.mrb[28].mxu0  ;;  %v3577_v37 = vpop.f32.mrb[28].mxu1 }
 0x125   :  { %v443_v38 = vadd.f32 %v3463_v39, %v442_v36  ;;  %v2279_v40 = vpop.f32.mrb[29].mxu0  ;;  %v826_v41 = vsel %vm699_vm15, %v438_v30, %v763_v35  ;;  %v2375_v42 = vpop.f32.mrb[29].mxu1  ;;  %v2918_v36 = vpack.c.bf16 %v1484_v33, %v1483_v32 }
 0x126   :  { %2496 = vmatmul.mubr.f32.gmra.mrb[88].mxu1 %v826_v41 }
 0x127   :  { %v764_v45 = vmul.f32 %v3471_v43, %v443_v38  ;;  %2498 = vmatprep.mubr.msk.f32.mxu1 %vm2946_vm0, %v2947_v6  ;;  %vm700_vm1 = vcmp.gt.f32.partialorder %v443_v38, 0.0  ;;  %2919 = vmatpush3.bf16.msra.mxu0 %v2918_v36 }
 0x128   :  { %v447_v46 = vpop.f32.mrb[30].mxu0  ;;  %v3583_v48 = vpop.f32.mrb[30].mxu1 }
 0x129   :  { %v448_v49 = vadd.f32 %v3463_v39, %v447_v46  ;;  %v2282_v50 = vpop.f32.mrb[31].mxu0  ;;  %v827_v52 = vsel %vm700_vm1, %v443_v38, %v764_v45  ;;  %v2378_v53 = vpop.f32.mrb[31].mxu1 }
 0x12a   :  { %2499 = vmatmul.mubr.f32.gmra.mrb[90].mxu1 %v827_v52 }
 0x12b   :  { %v765_v57 = vmul.f32 %v3471_v43, %v448_v49  ;;  %2501 = vmatprep.mubr.msk.f32.mxu1 %vm2946_vm0, %v2947_v6  ;;  %vm701_vm2 = vcmp.gt.f32.partialorder %v448_v49, 0.0 }
 0x12c   :  { %v452_v60 = vpop.f32.mrb[32].mxu0  ;;  %v3595_v61 = vpop.f32.mrb[32].mxu1 }
 0x12d   :  { %v453_v62 = vadd.f32 %v3463_v39, %v452_v60  ;;  %v2285_v0 = vpop.f32.mrb[33].mxu0  ;;  %v828_v2 = vsel %vm701_vm2, %v448_v49, %v765_v57  ;;  %v2381_v4 = vpop.f32.mrb[33].mxu1 }
 0x12e   :  { %2502 = vmatmul.mubr.f32.gmra.mrb[92].mxu1 %v828_v2 }
 0x12f   :  { %v766_v5 = vmul.f32 %v3471_v43, %v453_v62  ;;  %2504 = vmatprep.mubr.msk.f32.mxu1 %vm2946_vm0, %v2947_v6  ;;  %vm702_vm3 = vcmp.gt.f32.partialorder %v453_v62, 0.0 }
 0x130   :  { %v457_v7 = vpop.f32.mrb[34].mxu0  ;;  %v3602_v8 = vpop.f32.mrb[34].mxu1 }
 0x131   :  { %v458_v10 = vadd.f32 %v3463_v39, %v457_v7  ;;  %v2288_v11 = vpop.f32.mrb[35].mxu0  ;;  %v829_v12 = vsel %vm702_vm3, %v453_v62, %v766_v5  ;;  %v2384_v14 = vpop.f32.mrb[35].mxu1 }
 0x132   :  { %2505 = vmatmul.mubr.f32.gmra.mrb[94].mxu1 %v829_v12 }
 0x133   :  { %v767_v15 = vmul.f32 %v3471_v43, %v458_v10  ;;  %2507 = vmatprep.mubr.msk.f32.mxu1 %vm2946_vm0, %v2947_v6  ;;  %vm703_vm4 = vcmp.gt.f32.partialorder %v458_v10, 0.0 }
 0x134   :  { %v462_v3 = vpop.f32.mrb[36].mxu0  ;;  %v3608_v16 = vpop.f32.mrb[36].mxu1 }
 0x135   :  { %v463_v17 = vadd.f32 %v3463_v39, %v462_v3  ;;  %v2291_v18 = vpop.f32.mrb[37].mxu0  ;;  %v830_v19 = vsel %vm703_vm4, %v458_v10, %v767_v15  ;;  %v2387_v22 = vpop.f32.mrb[37].mxu1 }
 0x136   :  { %2508 = vmatmul.mubr.f32.gmra.mrb[96].mxu1 %v830_v19 }
 0x137   :  { %v768_v23 = vmul.f32 %v3471_v43, %v463_v17  ;;  %2510 = vmatprep.mubr.msk.f32.mxu1 %vm2946_vm0, %v2947_v6  ;;  %vm704_vm5 = vcmp.gt.f32.partialorder %v463_v17, 0.0 }
 0x138   :  { %v467_v24 = vpop.f32.mrb[38].mxu0  ;;  %v3614_v25 = vpop.f32.mrb[38].mxu1 }
 0x139   :  { %v468_v26 = vadd.f32 %v3463_v39, %v467_v24  ;;  %v2294_v28 = vpop.f32.mrb[39].mxu0  ;;  %v831_v30 = vsel %vm704_vm5, %v463_v17, %v768_v23  ;;  %v2390_v31 = vpop.f32.mrb[39].mxu1 }
 0x13a   :  { %2511 = vmatmul.mubr.f32.gmra.mrb[98].mxu1 %v831_v30 }
 0x13b   :  { %v769_v35 = vmul.f32 %v3471_v43, %v468_v26  ;;  %2513 = vmatprep.mubr.msk.f32.mxu1 %vm2946_vm0, %v2947_v6  ;;  %vm705_vm6 = vcmp.gt.f32.partialorder %v468_v26, 0.0 }
 0x13c   :  { %v472_v38 = vpop.f32.mrb[40].mxu0  ;;  %v3626_v40 = vpop.f32.mrb[40].mxu1 }
 0x13d   :  { %v473_v41 = vadd.f32 %v3463_v39, %v472_v38  ;;  %v2297_v42 = vpop.f32.mrb[41].mxu0  ;;  %v832_v45 = vsel %vm705_vm6, %v468_v26, %v769_v35  ;;  %v2393_v46 = vpop.f32.mrb[41].mxu1 }
 0x13e   :  { %2514 = vmatmul.mubr.f32.gmra.mrb[100].mxu1 %v832_v45 }
 0x13f   :  { %v770_v49 = vmul.f32 %v3471_v43, %v473_v41  ;;  %2516 = vmatprep.mubr.msk.f32.mxu1 %vm2946_vm0, %v2947_v6  ;;  %vm706_vm7 = vcmp.gt.f32.partialorder %v473_v41, 0.0 }
 0x140   :  { %v477_v50 = vpop.f32.mrb[42].mxu0  ;;  %v3632_v52 = vpop.f32.mrb[42].mxu1 }
 0x141   :  { %v478_v53 = vadd.f32 %v3463_v39, %v477_v50  ;;  %v2300_v54 = vpop.f32.mrb[43].mxu0  ;;  %v833_v56 = vsel %vm706_vm7, %v473_v41, %v770_v49  ;;  %v2396_v57 = vpop.f32.mrb[43].mxu1 }
 0x142   :  { %2517 = vmatmul.mubr.f32.gmra.mrb[102].mxu1 %v833_v56 }
 0x143   :  { %v771_v59 = vmul.f32 %v3471_v43, %v478_v53  ;;  %2519 = vmatprep.mubr.msk.f32.mxu1 %vm2946_vm0, %v2947_v6  ;;  %vm707_vm8 = vcmp.gt.f32.partialorder %v478_v53, 0.0 }
 0x144   :  { %v482_v60 = vpop.f32.mrb[44].mxu0  ;;  %v3638_v62 = vpop.f32.mrb[44].mxu1 }
 0x145   :  { %v483_v0 = vadd.f32 %v3463_v39, %v482_v60  ;;  %v2303_v2 = vpop.f32.mrb[45].mxu0  ;;  %v834_v4 = vsel %vm707_vm8, %v478_v53, %v771_v59  ;;  %v2399_v5 = vpop.f32.mrb[45].mxu1 }
 0x146   :  { %2520 = vmatmul.mubr.f32.gmra.mrb[104].mxu1 %v834_v4 }
 0x147   :  { %v772_v7 = vmul.f32 %v3471_v43, %v483_v0  ;;  %2522 = vmatprep.mubr.msk.f32.mxu1 %vm2946_vm0, %v2947_v6  ;;  %vm708_vm9 = vcmp.gt.f32.partialorder %v483_v0, 0.0 }
 0x148   :  { %v487_v10 = vpop.f32.mrb[46].mxu0  ;;  %v3644_v11 = vpop.f32.mrb[46].mxu1 }
 0x149   :  { %v488_v12 = vadd.f32 %v3463_v39, %v487_v10  ;;  %v2306_v14 = vpop.f32.mrb[47].mxu0  ;;  %v835_v15 = vsel %vm708_vm9, %v483_v0, %v772_v7  ;;  %v2402_v3 = vpop.f32.mrb[47].mxu1 }
 0x14a   :  { %2523 = vmatmul.mubr.f32.gmra.mrb[106].mxu1 %v835_v15 }
 0x14b   :  { %v773_v17 = vmul.f32 %v3471_v43, %v488_v12  ;;  %2525 = vmatprep.mubr.msk.f32.mxu1 %vm2946_vm0, %v2947_v6  ;;  %vm709_vm10 = vcmp.gt.f32.partialorder %v488_v12, 0.0 }
 0x14c   :  { %v492_v18 = vpop.f32.mrb[48].mxu0  ;;  %v3650_v19 = vpop.f32.mrb[48].mxu1 }
 0x14d   :  { %v493_v22 = vadd.f32 %v3463_v39, %v492_v18  ;;  %v2309_v23 = vpop.f32.mrb[49].mxu0  ;;  %v836_v24 = vsel %vm709_vm10, %v488_v12, %v773_v17  ;;  %v2405_v26 = vpop.f32.mrb[49].mxu1 }
 0x14e   :  { %2526 = vmatmul.mubr.f32.gmra.mrb[108].mxu1 %v836_v24 }
 0x14f   :  { %v774_v28 = vmul.f32 %v3471_v43, %v493_v22  ;;  %2528 = vmatprep.mubr.msk.f32.mxu1 %vm2946_vm0, %v2947_v6  ;;  %vm710_vm11 = vcmp.gt.f32.partialorder %v493_v22, 0.0 }
 0x150   :  { %v497_v30 = vpop.f32.mrb[50].mxu0  ;;  %v3656_v31 = vpop.f32.mrb[50].mxu1 }
 0x151   :  { %v498_v32 = vadd.f32 %v3463_v39, %v497_v30  ;;  %v2312_v33 = vpop.f32.mrb[51].mxu0  ;;  %v837_v35 = vsel %vm710_vm11, %v493_v22, %v774_v28  ;;  %v2408_v36 = vpop.f32.mrb[51].mxu1 }
 0x152   :  { %2529 = vmatmul.mubr.f32.gmra.mrb[110].mxu1 %v837_v35 }
 0x153   :  { %v775_v38 = vmul.f32 %v3471_v43, %v498_v32  ;;  %2531 = vmatprep.mubr.msk.f32.mxu1 %vm2946_vm0, %v2947_v6  ;;  %vm711_vm12 = vcmp.gt.f32.partialorder %v498_v32, 0.0 }
 0x154   :  { %v502_v41 = vpop.f32.mrb[52].mxu0  ;;  %v3662_v42 = vpop.f32.mrb[52].mxu1 }
 0x155   :  { %v503_v45 = vadd.f32 %v3463_v39, %v502_v41  ;;  %v2315_v46 = vpop.f32.mrb[53].mxu0  ;;  %v838_v49 = vsel %vm711_vm12, %v498_v32, %v775_v38  ;;  %v2411_v50 = vpop.f32.mrb[53].mxu1 }
 0x156   :  { %2532 = vmatmul.mubr.f32.gmra.mrb[112].mxu1 %v838_v49 }
 0x157   :  { %v776_v53 = vmul.f32 %v3471_v43, %v503_v45  ;;  %2534 = vmatprep.mubr.msk.f32.mxu1 %vm2946_vm0, %v2947_v6  ;;  %vm712_vm13 = vcmp.gt.f32.partialorder %v503_v45, 0.0 }
 0x158   :  { %v507_v54 = vpop.f32.mrb[54].mxu0  ;;  %v3668_v56 = vpop.f32.mrb[54].mxu1 }
 0x159   :  { %v508_v57 = vadd.f32 %v3463_v39, %v507_v54  ;;  %v2318_v59 = vpop.f32.mrb[55].mxu0  ;;  %v839_v60 = vsel %vm712_vm13, %v503_v45, %v776_v53  ;;  %v2414_v0 = vpop.f32.mrb[55].mxu1  ;;  %v533_v45 = vadd.f32 %v3463_v39, %v3473_v44 }
 0x15a   :  { %2535 = vmatmul.mubr.f32.gmra.mrb[114].mxu1 %v839_v60  ;;  %v543_v60 = vadd.f32 %v3463_v39, %v3484_v58  ;;  %v553_v58 = vadd.f32 %v3463_v39, %v3502_v13  ;;  %v563_v13 = vadd.f32 %v3463_v39, %v3515_v27  ;;  %v573_v27 = vadd.f32 %v3463_v39, %v3533_v47 }
 0x15b   :  { %v777_v2 = vmul.f32 %v3471_v43, %v508_v57  ;;  %2537 = vmatprep.mubr.msk.f32.mxu1 %vm2946_vm0, %v2947_v6  ;;  %vm713_vm14 = vcmp.gt.f32.partialorder %v508_v57, 0.0  ;;  %v782_v54 = vmul.f32 %v3471_v43, %v533_v45  ;;  %vm718_vm4 = vcmp.gt.f32.partialorder %v533_v45, 0.0 }
 0x15c   :  { %v512_v4 = vpop.f32.mrb[56].mxu0  ;;  %v3674_v5 = vpop.f32.mrb[56].mxu1  ;;  %vm720_vm6 = vcmp.gt.f32.partialorder %v543_v60, 0.0  ;;  %vm722_vm8 = vcmp.gt.f32.partialorder %v553_v58, 0.0  ;;  %vm724_vm10 = vcmp.gt.f32.partialorder %v563_v13, 0.0  ;;  %vm726_vm12 = vcmp.gt.f32.partialorder %v573_v27, 0.0 }
 0x15d   :  { %v513_v7 = vadd.f32 %v3463_v39, %v512_v4  ;;  %v2321_v10 = vpop.f32.mrb[57].mxu0  ;;  %v840_v12 = vsel %vm713_vm14, %v508_v57, %v777_v2  ;;  %v2417_v14 = vpop.f32.mrb[57].mxu1  ;;  %v538_v57 = vadd.f32 %v3463_v39, %v3478_v51  ;;  %v845_v0 = vsel %vm718_vm4, %v533_v45, %v782_v54 }
 0x15e   :  { %2538 = vmatmul.mubr.f32.gmra.mrb[116].mxu1 %v840_v12  ;;  %v784_v2 = vmul.f32 %v3471_v43, %v543_v60  ;;  %v548_v51 = vadd.f32 %v3463_v39, %v3490_v1  ;;  %v786_v12 = vmul.f32 %v3471_v43, %v553_v58  ;;  %v558_v1 = vadd.f32 %v3463_v39, %v3509_v20 }
 0x15f   :  { %v778_v15 = vmul.f32 %v3471_v43, %v513_v7  ;;  %2540 = vmatprep.mubr.msk.f32.mxu1 %vm2946_vm0, %v2947_v6  ;;  %vm714_vm15 = vcmp.gt.f32.partialorder %v513_v7, 0.0  ;;  %v783_v44 = vmul.f32 %v3471_v43, %v538_v57  ;;  %vm719_vm5 = vcmp.gt.f32.partialorder %v538_v57, 0.0 }
 0x160   :  { %v517_v3 = vpop.f32.mrb[58].mxu0  ;;  %v3680_v17 = vpop.f32.mrb[58].mxu1  ;;  %v847_v10 = vsel %vm720_vm6, %v543_v60, %v784_v2  ;;  %vm721_vm7 = vcmp.gt.f32.partialorder %v548_v51, 0.0  ;;  %vm723_vm9 = vcmp.gt.f32.partialorder %v558_v1, 0.0  ;;  %v568_v20 = vadd.f32 %v3463_v39, %v3521_v34 }
 0x161   :  { %v518_v18 = vadd.f32 %v3463_v39, %v517_v3  ;;  %v2324_v22 = vpop.f32.mrb[59].mxu0  ;;  %v841_v23 = vsel %vm714_vm15, %v513_v7, %v778_v15  ;;  %v2420_v24 = vpop.f32.mrb[59].mxu1  ;;  %v846_v4 = vsel %vm719_vm5, %v538_v57, %v783_v44  ;;  %v785_v7 = vmul.f32 %v3471_v43, %v548_v51 }
 0x162   :  { %2541 = vmatmul.mubr.f32.gmra.mrb[118].mxu1 %v841_v23  ;;  %v787_v15 = vmul.f32 %v3471_v43, %v558_v1  ;;  %v849_v3 = vsel %vm722_vm8, %v553_v58, %v786_v12  ;;  %v789_v23 = vmul.f32 %v3471_v43, %v568_v20  ;;  %vm725_vm11 = vcmp.gt.f32.partialorder %v568_v20, 0.0 }
 0x163   :  { %v779_v26 = vmul.f32 %v3471_v43, %v518_v18  ;;  %2543 = vmatprep.mubr.msk.f32.mxu1 %vm2946_vm0, %v2947_v6  ;;  %vm715_vm1 = vcmp.gt.f32.partialorder %v518_v18, 0.0  ;;  %v848_v14 = vsel %vm721_vm7, %v548_v51, %v785_v7  ;;  %v578_v34 = vadd.f32 %v3463_v39, %v3540_v55 }
 0x164   :  { %v522_v28 = vpop.f32.mrb[60].mxu0  ;;  %v3686_v30 = vpop.f32.mrb[60].mxu1  ;;  %v850_v22 = vsel %vm723_vm9, %v558_v1, %v787_v15  ;;  %v583_v47 = vadd.f32 %v3463_v39, %v3546_v63  ;;  %v588_v55 = vadd.f32 %v3463_v39, %v3552_v9  ;;  %v593_v63 = vadd.f32 %v3463_v39, %v3564_v21  ;;  %v3809_v15 = vld [vmem:[%s4433_s5] ss:$0 sm:$0xff] }
 0x165   :  { %v523_v32 = vadd.f32 %v3463_v39, %v522_v28  ;;  %v2327_v33 = vpop.f32.mrb[61].mxu0  ;;  %v842_v35 = vsel %vm715_vm1, %v518_v18, %v779_v26  ;;  %v2423_v36 = vpop.f32.mrb[61].mxu1  ;;  %v788_v18 = vmul.f32 %v3471_v43, %v563_v13  ;;  %v790_v26 = vmul.f32 %v3471_v43, %v573_v27 }
 0x166   :  { %2544 = vmatmul.mubr.f32.gmra.mrb[120].mxu1 %v842_v35  ;;  %v852_v28 = vsel %vm725_vm11, %v568_v20, %v789_v23  ;;  %vm727_vm13 = vcmp.gt.f32.partialorder %v578_v34, 0.0  ;;  %v792_v35 = vmul.f32 %v3471_v43, %v583_v47  ;;  %vm728_vm14 = vcmp.gt.f32.partialorder %v583_v47, 0.0 }
 0x167   :  { %v780_v38 = vmul.f32 %v3471_v43, %v523_v32  ;;  %2546 = vmatprep.mubr.msk.f32.mxu1 %vm2946_vm0, %v2947_v6  ;;  %vm716_vm2 = vcmp.gt.f32.partialorder %v523_v32, 0.0  ;;  %v851_v24 = vsel %vm724_vm10, %v563_v13, %v788_v18  ;;  %v853_v33 = vsel %vm726_vm12, %v573_v27, %v790_v26 }
 0x168   :  { %v527_v41 = vpop.f32.mrb[62].mxu0  ;;  %vm729_vm15 = vcmp.gt.f32.partialorder %v588_v55, 0.0  ;;  %v794_v45 = vmul.f32 %v3471_v43, %v593_v63  ;;  %v598_v9 = vadd.f32 %v3463_v39, %v3571_v29  ;;  %vm730_vm1 = vcmp.gt.f32.partialorder %v593_v63, 0.0 }
 0x169   :  { %v528_v46 = vadd.f32 %v3463_v39, %v527_v41  ;;  %v2330_v49 = vpop.f32.mrb[63].mxu0  ;;  %v843_v50 = vsel %vm716_vm2, %v523_v32, %v780_v38  ;;  %v791_v32 = vmul.f32 %v3471_v43, %v578_v34  ;;  %v793_v38 = vmul.f32 %v3471_v43, %v588_v55 }
 0x16a   :  { %2547 = vmatmul.mubr.f32.gmra.mrb[122].mxu1 %v843_v50  ;;  %v855_v41 = vsel %vm728_vm14, %v583_v47, %v792_v35  ;;  %v795_v49 = vmul.f32 %v3471_v43, %v598_v9  ;;  %v603_v21 = vadd.f32 %v3463_v39, %v3577_v37  ;;  %v857_v50 = vsel %vm730_vm1, %v593_v63, %v794_v45 }
 0x16b   :  { %v781_v53 = vmul.f32 %v3471_v43, %v528_v46  ;;  %2549 = vmatprep.mubr.msk.f32.mxu1 %vm2946_vm0, %v2947_v6  ;;  %vm717_vm3 = vcmp.gt.f32.partialorder %v528_v46, 0.0  ;;  %v854_v36 = vsel %vm727_vm13, %v578_v34, %v791_v32  ;;  %vm731_vm2 = vcmp.gt.f32.partialorder %v598_v9, 0.0 }
 0x16c   :  { %v608_v29 = vadd.f32 %v3463_v39, %v3583_v48  ;;  %v858_v54 = vsel %vm731_vm2, %v598_v9, %v795_v49  ;;  %v613_v37 = vadd.f32 %v3463_v39, %v3595_v61  ;;  %v618_v48 = vadd.f32 %v3463_v39, %v3602_v8 }
 0x16d   :  { %v844_v59 = vsel %vm717_vm3, %v528_v46, %v781_v53  ;;  %v856_v46 = vsel %vm729_vm15, %v588_v55, %v793_v38  ;;  %v796_v53 = vmul.f32 %v3471_v43, %v603_v21  ;;  %vm732_vm3 = vcmp.gt.f32.partialorder %v603_v21, 0.0 }
 0x16e   :  { %2550 = vmatmul.mubr.f32.gmra.mrb[124].mxu1 %v844_v59  ;;  %v797_v57 = vmul.f32 %v3471_v43, %v608_v29  ;;  %vm733_vm4 = vcmp.gt.f32.partialorder %v608_v29, 0.0  ;;  %v798_v44 = vmul.f32 %v3471_v43, %v613_v37  ;;  %vm734_vm5 = vcmp.gt.f32.partialorder %v613_v37, 0.0 }
 0x16f   :  { %2552 = vmatprep.mubr.msk.f32.mxu1 %vm2946_vm0, %v2947_v6  ;;  %v859_v59 = vsel %vm732_vm3, %v603_v21, %v796_v53  ;;  %v623_v61 = vadd.f32 %v3463_v39, %v3608_v16  ;;  %vm735_vm6 = vcmp.gt.f32.partialorder %v618_v48, 0.0  ;;  %v628_v8 = vadd.f32 %v3463_v39, %v3614_v25 }
 0x170   :  { %v860_v60 = vsel %vm733_vm4, %v608_v29, %v797_v57  ;;  %v861_v2 = vsel %vm734_vm5, %v613_v37, %v798_v44  ;;  %v633_v16 = vadd.f32 %v3463_v39, %v3626_v40  ;;  %v638_v25 = vadd.f32 %v3463_v39, %v3632_v52 }
 0x171   :  { %v800_v51 = vmul.f32 %v3471_v43, %v623_v61  ;;  %vm736_vm7 = vcmp.gt.f32.partialorder %v623_v61, 0.0  ;;  %v801_v7 = vmul.f32 %v3471_v43, %v628_v8  ;;  %vm737_vm8 = vcmp.gt.f32.partialorder %v628_v8, 0.0 }
 0x172   :  { %2553 = vmatmul.mubr.f32.gmra.mrb[126].mxu1 %v845_v0  ;;  %v799_v0 = vmul.f32 %v3471_v43, %v618_v48  ;;  %vm738_vm9 = vcmp.gt.f32.partialorder %v633_v16, 0.0  ;;  %v803_v40 = vmul.f32 %v3471_v43, %v638_v25  ;;  %v643_v1 = vadd.f32 %v3463_v39, %v3638_v62 }
 0x173   :  { %2555 = vmatprep.mubr.msk.f32.mxu1 %vm2946_vm0, %v2947_v6  ;;  %v863_v58 = vsel %vm736_vm7, %v623_v61, %v800_v51  ;;  %v864_v12 = vsel %vm737_vm8, %v628_v8, %v801_v7  ;;  %vm739_vm10 = vcmp.gt.f32.partialorder %v638_v25, 0.0  ;;  %v648_v13 = vadd.f32 %v3463_v39, %v3644_v11 }
 0x174   :  { %v804_v52 = vmul.f32 %v3471_v43, %v643_v1  ;;  %v3816_v18 = vstv %s1935_s6  ;;  %v866_v62 = vsel %vm739_vm10, %v638_v25, %v803_v40  ;;  %vm740_vm11 = vcmp.gt.f32.partialorder %v643_v1, 0.0 }
 0x175   :  { %v805_v27 = vmul.f32 %v3471_v43, %v648_v13  ;;  %v653_v11 = vadd.f32 %v3463_v39, %v3650_v19  ;;  %vm741_vm13 = vcmp.gt.f32.partialorder %v648_v13, 0.0 }
 0x176   :  { %2556 = vmatmul.mubr.f32.gmra.mrb[128].mxu1 %v846_v4  ;;  %v862_v4 = vsel %vm735_vm6, %v618_v48, %v799_v0  ;;  %v867_v26 = vsel %vm740_vm11, %v643_v1, %v804_v52 }
 0x177   :  { %2558 = vmatprep.mubr.msk.f32.mxu1 %vm2946_vm0, %v2947_v6  ;;  %v806_v19 = vmul.f32 %v3471_v43, %v653_v11  ;;  %v868_v55 = vsel %vm741_vm13, %v648_v13, %v805_v27  ;;  %vm742_vm15 = vcmp.gt.f32.partialorder %v653_v11, 0.0 }
 0x17a   :  { %2559 = vmatmul.mubr.f32.gmra.mrb[130].mxu1 %v847_v10  ;;  %v802_v10 = vmul.f32 %v3471_v43, %v633_v16 }
 0x17b   :  { %2561 = vmatprep.mubr.msk.f32.mxu1 %vm2946_vm0, %v2947_v6 }
 0x17e   :  { %2562 = vmatmul.mubr.f32.gmra.mrb[132].mxu1 %v848_v14  ;;  %v865_v14 = vsel %vm738_vm9, %v633_v16, %v802_v10 }
 0x17f   :  { %2564 = vmatprep.mubr.msk.f32.mxu1 %vm2946_vm0, %v2947_v6 }
 0x182   :  { %2565 = vmatmul.mubr.f32.gmra.mrb[134].mxu1 %v849_v3 }
 0x183   :  { %2567 = vmatprep.mubr.msk.f32.mxu1 %vm2946_vm0, %v2947_v6 }
 0x186   :  { %2568 = vmatmul.mubr.f32.gmra.mrb[136].mxu1 %v850_v22 }
 0x187   :  { %2570 = vmatprep.mubr.msk.f32.mxu1 %vm2946_vm0, %v2947_v6 }
 0x18a   :  { %2571 = vmatmul.mubr.f32.gmra.mrb[138].mxu1 %v851_v24 }
 0x18b   :  { %2573 = vmatprep.mubr.msk.f32.mxu1 %vm2946_vm0, %v2947_v6 }
 0x18e   :  { %2574 = vmatmul.mubr.f32.gmra.mrb[140].mxu1 %v852_v28 }
 0x18f   :  { %2576 = vmatprep.mubr.msk.f32.mxu1 %vm2946_vm0, %v2947_v6 }
 0x192   :  { %2577 = vmatmul.mubr.f32.gmra.mrb[142].mxu1 %v853_v33  ;;  %v658_v33 = vadd.f32 %v3463_v39, %v3656_v31  ;;  %v2928_v31 = vld [vmem:[%s4431_s3] ss:$0 sm:$0xff]  ;;  %s1936_s3 = sld [smem:[#allocation2 + $0x2]] }
 0x193   :  { %2579 = vmatprep.mubr.msk.f32.mxu1 %vm2946_vm0, %v2947_v6  ;;  %v663_v45 = vadd.f32 %v2928_v31, %v3662_v42  ;;  %v668_v29 = vadd.f32 %v2928_v31, %v3668_v56  ;;  %v678_v7 = vadd.f32 %v2928_v31, %v3680_v17  ;;  %v683_v1 = vadd.f32 %v2928_v31, %v3686_v30 }
 0x194   :  { %v807_v39 = vmul.f32 %v3471_v43, %v658_v33  ;;  %vm743_vm2 = vcmp.gt.f32.partialorder %v658_v33, 0.0 }
 0x195   :  { %v808_v42 = vmul.f32 %v3471_v43, %v663_v45  ;;  %vm744_vm4 = vcmp.gt.f32.partialorder %v663_v45, 0.0  ;;  %v809_v56 = vmul.f32 %v3471_v43, %v668_v29  ;;  %vm745_vm6 = vcmp.gt.f32.partialorder %v668_v29, 0.0 }
 0x196   :  { %2580 = vmatmul.mubr.f32.gmra.mrb[144].mxu1 %v854_v36  ;;  %v870_v57 = vsel %vm743_vm2, %v658_v33, %v807_v39  ;;  %v811_v17 = vmul.f32 %v3471_v43, %v678_v7  ;;  %vm747_vm10 = vcmp.gt.f32.partialorder %v678_v7, 0.0  ;;  %v812_v30 = vmul.f32 %v3471_v43, %v683_v1 }
 0x197   :  { %2582 = vmatprep.mubr.msk.f32.mxu1 %vm2946_vm0, %v2947_v6  ;;  %v871_v61 = vsel %vm744_vm4, %v663_v45, %v808_v42 }
 0x19a   :  { %2583 = vmatmul.mubr.f32.gmra.mrb[146].mxu1 %v855_v41 }
 0x19b   :  { %2585 = vmatprep.mubr.msk.f32.mxu1 %vm2946_vm0, %v2947_v6 }
 0x19e   :  { %2586 = vmatmul.mubr.f32.gmra.mrb[148].mxu1 %v856_v46  ;;  %v869_v46 = vsel %vm742_vm15, %v653_v11, %v806_v19 }
 0x19f   :  { %2588 = vmatprep.mubr.msk.f32.mxu1 %vm2946_vm0, %v2947_v6 }
 0x1a2   :  { %2589 = vmatmul.mubr.f32.gmra.mrb[150].mxu1 %v857_v50 }
 0x1a3   :  { %2591 = vmatprep.mubr.msk.f32.mxu1 %vm2946_vm0, %v2947_v6 }
 0x1a6   :  { %2592 = vmatmul.mubr.f32.gmra.mrb[152].mxu1 %v858_v54 }
 0x1a7   :  { %2594 = vmatprep.mubr.msk.f32.mxu1 %vm2946_vm0, %v2947_v6 }
 0x1aa   :  { %2595 = vmatmul.mubr.f32.gmra.mrb[154].mxu1 %v859_v59 }
 0x1ab   :  { %2597 = vmatprep.mubr.msk.f32.mxu1 %vm2946_vm0, %v2947_v6 }
 0x1ae   :  { %2598 = vmatmul.mubr.f32.gmra.mrb[156].mxu1 %v860_v60  ;;  %v673_v60 = vadd.f32 %v2928_v31, %v3674_v5 }
 0x1af   :  { %2600 = vmatprep.mubr.msk.f32.mxu1 %vm2946_vm0, %v2947_v6 }
 0x1b0   :  { %v810_v5 = vmul.f32 %v3471_v43, %v673_v60  ;;  %vm746_vm8 = vcmp.gt.f32.partialorder %v673_v60, 0.0 }
 0x1b2   :  { %2601 = vmatmul.mubr.f32.gmra.mrb[158].mxu1 %v861_v2  ;;  %v873_v52 = vsel %vm746_vm8, %v673_v60, %v810_v5 }
 0x1b3   :  { %2603 = vmatprep.mubr.msk.f32.mxu1 %vm2946_vm0, %v2947_v6 }
 0x1b6   :  { %2604 = vmatmul.mubr.f32.gmra.mrb[160].mxu1 %v862_v4 }
 0x1b7   :  { %2606 = vmatprep.mubr.msk.f32.mxu1 %vm2946_vm0, %v2947_v6 }
 0x1ba   :  { %2607 = vmatmul.mubr.f32.gmra.mrb[162].mxu1 %v863_v58  ;;  %v872_v58 = vsel %vm745_vm6, %v668_v29, %v809_v56 }
 0x1bb   :  { %2609 = vmatprep.mubr.msk.f32.mxu1 %vm2946_vm0, %v2947_v6 }
 0x1be   :  { %2610 = vmatmul.mubr.f32.gmra.mrb[164].mxu1 %v864_v12 }
 0x1bf   :  { %2612 = vmatprep.mubr.msk.f32.mxu1 %vm2946_vm0, %v2947_v6 }
 0x1c2   :  { %2613 = vmatmul.mubr.f32.gmra.mrb[166].mxu1 %v865_v14 }
 0x1c3   :  { %2615 = vmatprep.mubr.msk.f32.mxu1 %vm2946_vm0, %v2947_v6 }
 0x1c5   :  { %v965_v3 = vpop.f32.mrb[62].mxu1 }
 0x1c6   :  { %v966_v20 = vadd.f32 %v3809_v15, %v965_v3  ;;  %v2458_v22 = vpop.f32.mrb[63].mxu1  ;;  %2616 = vmatmul.mubr.f32.gmra.mrb[168].mxu1 %v866_v62 }
 0x1c7   :  { %2618 = vmatprep.mubr.msk.f32.mxu1 %vm2946_vm0, %v2947_v6 }
 0x1c8   :  { %vm1279_vm12 = vcmp.gt.f32.partialorder %v966_v20, 0.0  ;;  %v1343_v23 = vmul.f32 %v3816_v18, %v966_v20 }
 0x1c9   :  { %v970_v24 = vpop.f32.mrb[64].mxu1 }
 0x1ca   :  { %v1406_v34 = vsel %vm1279_vm12, %v966_v20, %v1343_v23  ;;  %v971_v28 = vadd.f32 %v3809_v15, %v970_v24  ;;  %v2461_v32 = vpop.f32.mrb[65].mxu1  ;;  %2619 = vmatmul.mubr.f32.gmra.mrb[170].mxu1 %v867_v26  ;;  %v874_v23 = vsel %vm747_vm10, %v678_v7, %v811_v17  ;;  %vm748_vm12 = vcmp.gt.f32.partialorder %v683_v1, 0.0 }
 0x1cb   :  { %2678 = vmatmul.mubr.f32.vlgmr.msra.gmra.mrb[64].mxu0 %v1406_v34  ;;  %2621 = vmatprep.mubr.msk.f32.mxu1 %vm2946_vm0, %v2947_v6  ;;  %v875_v43 = vsel %vm748_vm12, %v683_v1, %v812_v30 }
 0x1cc   :  { %v1344_v47 = vmul.f32 %v3816_v18, %v971_v28  ;;  %2680 = vmatprep.mubr.msk.f32.mxu0 %vm2946_vm0, %v2947_v6  ;;  %vm1280_vm14 = vcmp.gt.f32.partialorder %v971_v28, 0.0 }
 0x1cd   :  { %v975_v35 = vpop.f32.mrb[66].mxu1 }
 0x1ce   :  { %v976_v36 = vadd.f32 %v3809_v15, %v975_v35  ;;  %v2464_v38 = vpop.f32.mrb[67].mxu1  ;;  %2622 = vmatmul.mubr.f32.gmra.mrb[172].mxu1 %v868_v55  ;;  %v1407_v63 = vsel %vm1280_vm14, %v971_v28, %v1344_v47 }
 0x1cf   :  { %2681 = vmatmul.mubr.f32.gmra.mrb[66].mxu0 %v1407_v63  ;;  %2624 = vmatprep.mubr.msk.f32.mxu1 %vm2946_vm0, %v2947_v6 }
 0x1d0   :  { %v1345_v41 = vmul.f32 %v3816_v18, %v976_v36  ;;  %2683 = vmatprep.mubr.msk.f32.mxu0 %vm2946_vm0, %v2947_v6  ;;  %vm1281_vm1 = vcmp.gt.f32.partialorder %v976_v36, 0.0 }
 0x1d1   :  { %v980_v9 = vpop.f32.mrb[68].mxu1 }
 0x1d2   :  { %v981_v49 = vadd.f32 %v3809_v15, %v980_v9  ;;  %v2467_v21 = vpop.f32.mrb[69].mxu1  ;;  %2625 = vmatmul.mubr.f32.gmra.mrb[174].mxu1 %v869_v46  ;;  %v1408_v50 = vsel %vm1281_vm1, %v976_v36, %v1345_v41 }
 0x1d3   :  { %2684 = vmatmul.mubr.f32.gmra.mrb[68].mxu0 %v1408_v50  ;;  %2627 = vmatprep.mubr.msk.f32.mxu1 %vm2946_vm0, %v2947_v6 }
 0x1d4   :  { %v1346_v53 = vmul.f32 %v3816_v18, %v981_v49  ;;  %2686 = vmatprep.mubr.msk.f32.mxu0 %vm2946_vm0, %v2947_v6  ;;  %vm1282_vm3 = vcmp.gt.f32.partialorder %v981_v49, 0.0 }
 0x1d5   :  { %v985_v54 = vpop.f32.mrb[70].mxu1 }
 0x1d6   :  { %v986_v37 = vadd.f32 %v3809_v15, %v985_v54  ;;  %v2470_v59 = vpop.f32.mrb[71].mxu1  ;;  %2628 = vmatmul.mubr.f32.gmra.mrb[176].mxu1 %v870_v57  ;;  %v1409_v44 = vsel %vm1282_vm3, %v981_v49, %v1346_v53 }
 0x1d7   :  { %2687 = vmatmul.mubr.f32.gmra.mrb[70].mxu0 %v1409_v44  ;;  %2630 = vmatprep.mubr.msk.f32.mxu1 %vm2946_vm0, %v2947_v6 }
 0x1d8   :  { %v1347_v48 = vmul.f32 %v3816_v18, %v986_v37  ;;  %2689 = vmatprep.mubr.msk.f32.mxu0 %vm2946_vm0, %v2947_v6  ;;  %vm1283_vm5 = vcmp.gt.f32.partialorder %v986_v37, 0.0 }
 0x1d9   :  { %v990_v0 = vpop.f32.mrb[72].mxu1 }
 0x1da   :  { %v991_v2 = vadd.f32 %v3809_v15, %v990_v0  ;;  %v2473_v51 = vpop.f32.mrb[73].mxu1  ;;  %2631 = vmatmul.mubr.f32.gmra.mrb[178].mxu1 %v871_v61  ;;  %v1410_v8 = vsel %vm1283_vm5, %v986_v37, %v1347_v48 }
 0x1db   :  { %2690 = vmatmul.mubr.f32.gmra.mrb[72].mxu0 %v1410_v8  ;;  %2633 = vmatprep.mubr.msk.f32.mxu1 %vm2946_vm0, %v2947_v6 }
 0x1dc   :  { %v1348_v4 = vmul.f32 %v3816_v18, %v991_v2  ;;  %2692 = vmatprep.mubr.msk.f32.mxu0 %vm2946_vm0, %v2947_v6  ;;  %vm1284_vm7 = vcmp.gt.f32.partialorder %v991_v2, 0.0 }
 0x1dd   :  { %v995_v16 = vpop.f32.mrb[74].mxu1 }
 0x1de   :  { %v996_v10 = vadd.f32 %v3809_v15, %v995_v16  ;;  %v2476_v25 = vpop.f32.mrb[75].mxu1  ;;  %2634 = vmatmul.mubr.f32.gmra.mrb[180].mxu1 %v872_v58  ;;  %v1411_v12 = vsel %vm1284_vm7, %v991_v2, %v1348_v4 }
 0x1df   :  { %2693 = vmatmul.mubr.f32.gmra.mrb[74].mxu0 %v1411_v12  ;;  %2636 = vmatprep.mubr.msk.f32.mxu1 %vm2946_vm0, %v2947_v6 }
 0x1e0   :  { %v1349_v40 = vmul.f32 %v3816_v18, %v996_v10  ;;  %2695 = vmatprep.mubr.msk.f32.mxu0 %vm2946_vm0, %v2947_v6  ;;  %vm1285_vm9 = vcmp.gt.f32.partialorder %v996_v10, 0.0 }
 0x1e1   :  { %v1000_v14 = vpop.f32.mrb[76].mxu1 }
 0x1e2   :  { %v1001_v13 = vadd.f32 %v3809_v15, %v1000_v14  ;;  %v2479_v3 = vpop.f32.mrb[77].mxu1  ;;  %2637 = vmatmul.mubr.f32.gmra.mrb[182].mxu1 %v873_v52  ;;  %v1412_v62 = vsel %vm1285_vm9, %v996_v10, %v1349_v40 }
 0x1e3   :  { %2696 = vmatmul.mubr.f32.gmra.mrb[76].mxu0 %v1412_v62  ;;  %2639 = vmatprep.mubr.msk.f32.mxu1 %vm2946_vm0, %v2947_v6 }
 0x1e4   :  { %v1350_v20 = vmul.f32 %v3816_v18, %v1001_v13  ;;  %2698 = vmatprep.mubr.msk.f32.mxu0 %vm2946_vm0, %v2947_v6  ;;  %vm1286_vm11 = vcmp.gt.f32.partialorder %v1001_v13, 0.0 }
 0x1e5   :  { %v1005_v22 = vpop.f32.mrb[78].mxu1 }
 0x1e6   :  { %v1006_v27 = vadd.f32 %v3809_v15, %v1005_v22  ;;  %v2482_v11 = vpop.f32.mrb[79].mxu1  ;;  %2640 = vmatmul.mubr.f32.gmra.mrb[184].mxu1 %v874_v23  ;;  %v1413_v24 = vsel %vm1286_vm11, %v1001_v13, %v1350_v20 }
 0x1e7   :  { %2699 = vmatmul.mubr.f32.gmra.mrb[78].mxu0 %v1413_v24  ;;  %2642 = vmatprep.mubr.msk.f32.mxu1 %vm2946_vm0, %v2947_v6 }
 0x1e8   :  { %v1351_v26 = vmul.f32 %v3816_v18, %v1006_v27  ;;  %2701 = vmatprep.mubr.msk.f32.mxu0 %vm2946_vm0, %v2947_v6  ;;  %vm1287_vm13 = vcmp.gt.f32.partialorder %v1006_v27, 0.0 }
 0x1e9   :  { %v1010_v34 = vpop.f32.mrb[80].mxu1 }
 0x1ea   :  { %v1011_v28 = vadd.f32 %v3809_v15, %v1010_v34  ;;  %v2485_v32 = vpop.f32.mrb[81].mxu1  ;;  %2643 = vmatmul.mubr.f32.gmra.mrb[186].mxu1 %v875_v43  ;;  %v1414_v47 = vsel %vm1287_vm13, %v1006_v27, %v1351_v26 }
 0x1eb   :  { %2702 = vmatmul.mubr.f32.gmra.mrb[80].mxu0 %v1414_v47 }
 0x1ec   :  { %v1352_v19 = vmul.f32 %v3816_v18, %v1011_v28  ;;  %2704 = vmatprep.mubr.msk.f32.mxu0 %vm2946_vm0, %v2947_v6  ;;  %vm1288_vm14 = vcmp.gt.f32.partialorder %v1011_v28, 0.0 }
 0x1ed   :  { %v1015_v33 = vpop.f32.mrb[82].mxu1 }
 0x1ee   :  { %v1016_v35 = vadd.f32 %v3809_v15, %v1015_v33  ;;  %v2488_v55 = vpop.f32.mrb[83].mxu1  ;;  %v1415_v36 = vsel %vm1288_vm14, %v1011_v28, %v1352_v19 }
 0x1ef   :  { %2705 = vmatmul.mubr.f32.gmra.mrb[82].mxu0 %v1415_v36 }
 0x1f0   :  { %v1353_v38 = vmul.f32 %v3816_v18, %v1016_v35  ;;  %2707 = vmatprep.mubr.msk.f32.mxu0 %vm2946_vm0, %v2947_v6  ;;  %vm1289_vm15 = vcmp.gt.f32.partialorder %v1016_v35, 0.0 }
 0x1f1   :  { %v1020_v63 = vpop.f32.mrb[84].mxu1 }
 0x1f2   :  { %v1021_v41 = vadd.f32 %v3809_v15, %v1020_v63  ;;  %v2491_v39 = vpop.f32.mrb[85].mxu1  ;;  %v1416_v31 = vsel %vm1289_vm15, %v1016_v35, %v1353_v38 }
 0x1f3   :  { %2708 = vmatmul.mubr.f32.gmra.mrb[84].mxu0 %v1416_v31 }
 0x1f4   :  { %v1354_v45 = vmul.f32 %v3816_v18, %v1021_v41  ;;  %2710 = vmatprep.mubr.msk.f32.mxu0 %vm2946_vm0, %v2947_v6  ;;  %vm1290_vm1 = vcmp.gt.f32.partialorder %v1021_v41, 0.0 }
 0x1f5   :  { %v1025_v9 = vpop.f32.mrb[86].mxu1 }
 0x1f6   :  { %v1026_v46 = vadd.f32 %v3809_v15, %v1025_v9  ;;  %v2494_v49 = vpop.f32.mrb[87].mxu1  ;;  %v1417_v21 = vsel %vm1290_vm1, %v1021_v41, %v1354_v45 }
 0x1f7   :  { %2711 = vmatmul.mubr.f32.gmra.mrb[86].mxu0 %v1417_v21 }
 0x1f8   :  { %v1355_v50 = vmul.f32 %v3816_v18, %v1026_v46  ;;  %2713 = vmatprep.mubr.msk.f32.mxu0 %vm2946_vm0, %v2947_v6  ;;  %vm1291_vm2 = vcmp.gt.f32.partialorder %v1026_v46, 0.0 }
 0x1f9   :  { %v1030_v53 = vpop.f32.mrb[88].mxu1 }
 0x1fa   :  { %v1031_v42 = vadd.f32 %v3809_v15, %v1030_v53  ;;  %v2497_v29 = vpop.f32.mrb[89].mxu1  ;;  %v1418_v54 = vsel %vm1291_vm2, %v1026_v46, %v1355_v50 }
 0x1fb   :  { %2714 = vmatmul.mubr.f32.gmra.mrb[88].mxu0 %v1418_v54 }
 0x1fc   :  { %v1356_v57 = vmul.f32 %v3816_v18, %v1031_v42  ;;  %2716 = vmatprep.mubr.msk.f32.mxu0 %vm2946_vm0, %v2947_v6  ;;  %vm1292_vm3 = vcmp.gt.f32.partialorder %v1031_v42, 0.0 }
 0x1fd   :  { %v1035_v37 = vpop.f32.mrb[90].mxu1 }
 0x1fe   :  { %v1036_v59 = vadd.f32 %v3809_v15, %v1035_v37  ;;  %v2500_v44 = vpop.f32.mrb[91].mxu1  ;;  %v1419_v48 = vsel %vm1292_vm3, %v1031_v42, %v1356_v57 }
 0x1ff   :  { %2717 = vmatmul.mubr.f32.gmra.mrb[90].mxu0 %v1419_v48 }
 0x200   :  { %v1357_v56 = vmul.f32 %v3816_v18, %v1036_v59  ;;  %2719 = vmatprep.mubr.msk.f32.mxu0 %vm2946_vm0, %v2947_v6  ;;  %vm1293_vm4 = vcmp.gt.f32.partialorder %v1036_v59, 0.0 }
 0x201   :  { %v1040_v60 = vpop.f32.mrb[92].mxu1 }
 0x202   :  { %v1041_v0 = vadd.f32 %v3809_v15, %v1040_v60  ;;  %v2503_v61 = vpop.f32.mrb[93].mxu1  ;;  %v1420_v2 = vsel %vm1293_vm4, %v1036_v59, %v1357_v56 }
 0x203   :  { %2720 = vmatmul.mubr.f32.gmra.mrb[92].mxu0 %v1420_v2 }
 0x204   :  { %v1358_v51 = vmul.f32 %v3816_v18, %v1041_v0  ;;  %2722 = vmatprep.mubr.msk.f32.mxu0 %vm2946_vm0, %v2947_v6  ;;  %vm1294_vm5 = vcmp.gt.f32.partialorder %v1041_v0, 0.0 }
 0x205   :  { %v1045_v8 = vpop.f32.mrb[94].mxu1 }
 0x206   :  { %v1046_v4 = vadd.f32 %v3809_v15, %v1045_v8  ;;  %v2506_v5 = vpop.f32.mrb[95].mxu1  ;;  %v1421_v7 = vsel %vm1294_vm5, %v1041_v0, %v1358_v51 }
 0x207   :  { %2723 = vmatmul.mubr.f32.gmra.mrb[94].mxu0 %v1421_v7 }
 0x208   :  { %v1359_v16 = vmul.f32 %v3816_v18, %v1046_v4  ;;  %2725 = vmatprep.mubr.msk.f32.mxu0 %vm2946_vm0, %v2947_v6  ;;  %vm1295_vm6 = vcmp.gt.f32.partialorder %v1046_v4, 0.0 }
 0x209   :  { %v1050_v58 = vpop.f32.mrb[96].mxu1 }
 0x20a   :  { %v1051_v10 = vadd.f32 %v3809_v15, %v1050_v58  ;;  %v2509_v25 = vpop.f32.mrb[97].mxu1  ;;  %v1422_v12 = vsel %vm1295_vm6, %v1046_v4, %v1359_v16 }
 0x20b   :  { %2726 = vmatmul.mubr.f32.gmra.mrb[96].mxu0 %v1422_v12 }
 0x20c   :  { %v1360_v40 = vmul.f32 %v3816_v18, %v1051_v10  ;;  %2728 = vmatprep.mubr.msk.f32.mxu0 %vm2946_vm0, %v2947_v6  ;;  %vm1296_vm7 = vcmp.gt.f32.partialorder %v1051_v10, 0.0 }
 0x20d   :  { %v1055_v17 = vpop.f32.mrb[98].mxu1 }
 0x20e   :  { %v1056_v1 = vadd.f32 %v3809_v15, %v1055_v17  ;;  %v2512_v14 = vpop.f32.mrb[99].mxu1  ;;  %v1423_v52 = vsel %vm1296_vm7, %v1051_v10, %v1360_v40 }
 0x20f   :  { %2729 = vmatmul.mubr.f32.gmra.mrb[98].mxu0 %v1423_v52 }
 0x210   :  { %v1361_v13 = vmul.f32 %v3816_v18, %v1056_v1  ;;  %2731 = vmatprep.mubr.msk.f32.mxu0 %vm2946_vm0, %v2947_v6  ;;  %vm1297_vm8 = vcmp.gt.f32.partialorder %v1056_v1, 0.0 }
 0x211   :  { %v1060_v3 = vpop.f32.mrb[100].mxu1 }
 0x212   :  { %v1061_v62 = vadd.f32 %v3809_v15, %v1060_v3  ;;  %v2515_v20 = vpop.f32.mrb[101].mxu1  ;;  %v1424_v30 = vsel %vm1297_vm8, %v1056_v1, %v1361_v13 }
 0x213   :  { %2732 = vmatmul.mubr.f32.gmra.mrb[100].mxu0 %v1424_v30 }
 0x214   :  { %v1362_v22 = vmul.f32 %v3816_v18, %v1061_v62  ;;  %2734 = vmatprep.mubr.msk.f32.mxu0 %vm2946_vm0, %v2947_v6  ;;  %vm1298_vm9 = vcmp.gt.f32.partialorder %v1061_v62, 0.0 }
 0x215   :  { %v1065_v23 = vpop.f32.mrb[102].mxu1 }
 0x216   :  { %v1066_v27 = vadd.f32 %v3809_v15, %v1065_v23  ;;  %v2518_v11 = vpop.f32.mrb[103].mxu1  ;;  %v1425_v24 = vsel %vm1298_vm9, %v1061_v62, %v1362_v22 }
 0x217   :  { %2735 = vmatmul.mubr.f32.gmra.mrb[102].mxu0 %v1425_v24 }
 0x218   :  { %v1363_v26 = vmul.f32 %v3816_v18, %v1066_v27  ;;  %2737 = vmatprep.mubr.msk.f32.mxu0 %vm2946_vm0, %v2947_v6  ;;  %vm1299_vm10 = vcmp.gt.f32.partialorder %v1066_v27, 0.0 }
 0x219   :  { %v1070_v34 = vpop.f32.mrb[104].mxu1 }
 0x21a   :  { %v1071_v43 = vadd.f32 %v3809_v15, %v1070_v34  ;;  %v2521_v28 = vpop.f32.mrb[105].mxu1  ;;  %v1426_v32 = vsel %vm1299_vm10, %v1066_v27, %v1363_v26 }
 0x21b   :  { %2738 = vmatmul.mubr.f32.gmra.mrb[104].mxu0 %v1426_v32 }
 0x21c   :  { %v1364_v47 = vmul.f32 %v3816_v18, %v1071_v43  ;;  %2740 = vmatprep.mubr.msk.f32.mxu0 %vm2946_vm0, %v2947_v6  ;;  %vm1300_vm11 = vcmp.gt.f32.partialorder %v1071_v43, 0.0 }
 0x21d   :  { %v1075_v19 = vpop.f32.mrb[106].mxu1 }
 0x21e   :  { %v1076_v33 = vadd.f32 %v3809_v15, %v1075_v19  ;;  %v2524_v35 = vpop.f32.mrb[107].mxu1  ;;  %v1427_v55 = vsel %vm1300_vm11, %v1071_v43, %v1364_v47 }
 0x21f   :  { %2741 = vmatmul.mubr.f32.gmra.mrb[106].mxu0 %v1427_v55 }
 0x220   :  { %v1365_v36 = vmul.f32 %v3816_v18, %v1076_v33  ;;  %2743 = vmatprep.mubr.msk.f32.mxu0 %vm2946_vm0, %v2947_v6  ;;  %vm1301_vm12 = vcmp.gt.f32.partialorder %v1076_v33, 0.0 }
 0x221   :  { %v1080_v38 = vpop.f32.mrb[108].mxu1 }
 0x222   :  { %v1081_v63 = vadd.f32 %v3809_v15, %v1080_v38  ;;  %v2527_v41 = vpop.f32.mrb[109].mxu1  ;;  %v1428_v39 = vsel %vm1301_vm12, %v1076_v33, %v1365_v36 }
 0x223   :  { %2744 = vmatmul.mubr.f32.gmra.mrb[108].mxu0 %v1428_v39 }
 0x224   :  { %v1366_v31 = vmul.f32 %v3816_v18, %v1081_v63  ;;  %2746 = vmatprep.mubr.msk.f32.mxu0 %vm2946_vm0, %v2947_v6  ;;  %vm1302_vm13 = vcmp.gt.f32.partialorder %v1081_v63, 0.0 }
 0x225   :  { %v1085_v45 = vpop.f32.mrb[110].mxu1 }
 0x226   :  { %v1086_v9 = vadd.f32 %v3809_v15, %v1085_v45  ;;  %v2530_v46 = vpop.f32.mrb[111].mxu1  ;;  %v1429_v49 = vsel %vm1302_vm13, %v1081_v63, %v1366_v31 }
 0x227   :  { %2747 = vmatmul.mubr.f32.gmra.mrb[110].mxu0 %v1429_v49 }
 0x228   :  { %v1367_v21 = vmul.f32 %v3816_v18, %v1086_v9  ;;  %2749 = vmatprep.mubr.msk.f32.mxu0 %vm2946_vm0, %v2947_v6  ;;  %vm1303_vm14 = vcmp.gt.f32.partialorder %v1086_v9, 0.0 }
 0x229   :  { %v1090_v50 = vpop.f32.mrb[112].mxu1 }
 0x22a   :  { %v1091_v53 = vadd.f32 %v3809_v15, %v1090_v50  ;;  %v2533_v42 = vpop.f32.mrb[113].mxu1  ;;  %v1430_v29 = vsel %vm1303_vm14, %v1086_v9, %v1367_v21 }
 0x22b   :  { %2750 = vmatmul.mubr.f32.gmra.mrb[112].mxu0 %v1430_v29 }
 0x22c   :  { %v1368_v54 = vmul.f32 %v3816_v18, %v1091_v53  ;;  %2752 = vmatprep.mubr.msk.f32.mxu0 %vm2946_vm0, %v2947_v6  ;;  %vm1304_vm15 = vcmp.gt.f32.partialorder %v1091_v53, 0.0 }
 0x22d   :  { %v1095_v57 = vpop.f32.mrb[114].mxu1 }
 0x22e   :  { %v1096_v37 = vadd.f32 %v3809_v15, %v1095_v57  ;;  %v2536_v59 = vpop.f32.mrb[115].mxu1  ;;  %v1431_v44 = vsel %vm1304_vm15, %v1091_v53, %v1368_v54 }
 0x22f   :  { %2753 = vmatmul.mubr.f32.gmra.mrb[114].mxu0 %v1431_v44 }
 0x230   :  { %v1369_v48 = vmul.f32 %v3816_v18, %v1096_v37  ;;  %2755 = vmatprep.mubr.msk.f32.mxu0 %vm2946_vm0, %v2947_v6  ;;  %vm1305_vm1 = vcmp.gt.f32.partialorder %v1096_v37, 0.0 }
 0x231   :  { %v1100_v56 = vpop.f32.mrb[116].mxu1 }
 0x232   :  { %v1101_v60 = vadd.f32 %v3809_v15, %v1100_v56  ;;  %v2539_v0 = vpop.f32.mrb[117].mxu1  ;;  %v1432_v61 = vsel %vm1305_vm1, %v1096_v37, %v1369_v48 }
 0x233   :  { %2756 = vmatmul.mubr.f32.gmra.mrb[116].mxu0 %v1432_v61 }
 0x234   :  { %v1370_v2 = vmul.f32 %v3816_v18, %v1101_v60  ;;  %2758 = vmatprep.mubr.msk.f32.mxu0 %vm2946_vm0, %v2947_v6  ;;  %vm1306_vm2 = vcmp.gt.f32.partialorder %v1101_v60, 0.0 }
 0x235   :  { %v1105_v51 = vpop.f32.mrb[118].mxu1 }
 0x236   :  { %v1106_v8 = vadd.f32 %v3809_v15, %v1105_v51  ;;  %v2542_v4 = vpop.f32.mrb[119].mxu1  ;;  %v1433_v5 = vsel %vm1306_vm2, %v1101_v60, %v1370_v2 }
 0x237   :  { %2759 = vmatmul.mubr.f32.gmra.mrb[118].mxu0 %v1433_v5 }
 0x238   :  { %v1371_v7 = vmul.f32 %v3816_v18, %v1106_v8  ;;  %2761 = vmatprep.mubr.msk.f32.mxu0 %vm2946_vm0, %v2947_v6  ;;  %vm1307_vm3 = vcmp.gt.f32.partialorder %v1106_v8, 0.0 }
 0x239   :  { %v1110_v16 = vpop.f32.mrb[120].mxu1 }
 0x23a   :  { %v1111_v58 = vadd.f32 %v3809_v15, %v1110_v16  ;;  %v2545_v10 = vpop.f32.mrb[121].mxu1  ;;  %v1434_v25 = vsel %vm1307_vm3, %v1106_v8, %v1371_v7 }
 0x23b   :  { %2762 = vmatmul.mubr.f32.gmra.mrb[120].mxu0 %v1434_v25 }
 0x23c   :  { %v1372_v12 = vmul.f32 %v3816_v18, %v1111_v58  ;;  %2764 = vmatprep.mubr.msk.f32.mxu0 %vm2946_vm0, %v2947_v6  ;;  %vm1308_vm4 = vcmp.gt.f32.partialorder %v1111_v58, 0.0 }
 0x23d   :  { %v1115_v40 = vpop.f32.mrb[122].mxu1 }
 0x23e   :  { %v1116_v17 = vadd.f32 %v3809_v15, %v1115_v40  ;;  %v2548_v1 = vpop.f32.mrb[123].mxu1  ;;  %v1435_v14 = vsel %vm1308_vm4, %v1111_v58, %v1372_v12 }
 0x23f   :  { %2765 = vmatmul.mubr.f32.gmra.mrb[122].mxu0 %v1435_v14 }
 0x240   :  { %v1373_v52 = vmul.f32 %v3816_v18, %v1116_v17  ;;  %2767 = vmatprep.mubr.msk.f32.mxu0 %vm2946_vm0, %v2947_v6  ;;  %vm1309_vm5 = vcmp.gt.f32.partialorder %v1116_v17, 0.0 }
 0x241   :  { %v1120_v13 = vpop.f32.mrb[124].mxu1 }
 0x242   :  { %v1121_v3 = vadd.f32 %v3809_v15, %v1120_v13  ;;  %v2551_v62 = vpop.f32.mrb[125].mxu1  ;;  %v1436_v20 = vsel %vm1309_vm5, %v1116_v17, %v1373_v52 }
 0x243   :  { %2768 = vmatmul.mubr.f32.gmra.mrb[124].mxu0 %v1436_v20 }
 0x244   :  { %v1374_v30 = vmul.f32 %v3816_v18, %v1121_v3  ;;  %2770 = vmatprep.mubr.msk.f32.mxu0 %vm2946_vm0, %v2947_v6  ;;  %vm1310_vm6 = vcmp.gt.f32.partialorder %v1121_v3, 0.0 }
 0x245   :  { %v1125_v22 = vpop.f32.mrb[126].mxu1 }
 0x246   :  { %v1126_v23 = vadd.f32 %v3809_v15, %v1125_v22  ;;  %v2554_v27 = vpop.f32.mrb[127].mxu1  ;;  %v1437_v11 = vsel %vm1310_vm6, %v1121_v3, %v1374_v30 }
 0x247   :  { %2771 = vmatmul.mubr.f32.gmra.mrb[126].mxu0 %v1437_v11 }
 0x248   :  { %v1375_v24 = vmul.f32 %v3816_v18, %v1126_v23  ;;  %2773 = vmatprep.mubr.msk.f32.mxu0 %vm2946_vm0, %v2947_v6  ;;  %vm1311_vm7 = vcmp.gt.f32.partialorder %v1126_v23, 0.0 }
 0x249   :  { %v1130_v26 = vpop.f32.mrb[128].mxu1 }
 0x24a   :  { %v1131_v34 = vadd.f32 %v3809_v15, %v1130_v26  ;;  %v2557_v43 = vpop.f32.mrb[129].mxu1  ;;  %v1438_v28 = vsel %vm1311_vm7, %v1126_v23, %v1375_v24 }
 0x24b   :  { %2774 = vmatmul.mubr.f32.gmra.mrb[128].mxu0 %v1438_v28 }
 0x24c   :  { %v1376_v32 = vmul.f32 %v3816_v18, %v1131_v34  ;;  %2776 = vmatprep.mubr.msk.f32.mxu0 %vm2946_vm0, %v2947_v6  ;;  %vm1312_vm8 = vcmp.gt.f32.partialorder %v1131_v34, 0.0 }
 0x24d   :  { %v1135_v47 = vpop.f32.mrb[130].mxu1 }
 0x24e   :  { %v1136_v19 = vadd.f32 %v3809_v15, %v1135_v47  ;;  %v2560_v33 = vpop.f32.mrb[131].mxu1  ;;  %v1439_v35 = vsel %vm1312_vm8, %v1131_v34, %v1376_v32 }
 0x24f   :  { %2777 = vmatmul.mubr.f32.gmra.mrb[130].mxu0 %v1439_v35 }
 0x250   :  { %v1377_v55 = vmul.f32 %v3816_v18, %v1136_v19  ;;  %2779 = vmatprep.mubr.msk.f32.mxu0 %vm2946_vm0, %v2947_v6  ;;  %vm1313_vm9 = vcmp.gt.f32.partialorder %v1136_v19, 0.0 }
 0x251   :  { %v1140_v36 = vpop.f32.mrb[132].mxu1 }
 0x252   :  { %v1141_v38 = vadd.f32 %v3809_v15, %v1140_v36  ;;  %v2563_v63 = vpop.f32.mrb[133].mxu1  ;;  %v1440_v41 = vsel %vm1313_vm9, %v1136_v19, %v1377_v55 }
 0x253   :  { %2780 = vmatmul.mubr.f32.gmra.mrb[132].mxu0 %v1440_v41 }
 0x254   :  { %v1378_v39 = vmul.f32 %v3816_v18, %v1141_v38  ;;  %2782 = vmatprep.mubr.msk.f32.mxu0 %vm2946_vm0, %v2947_v6  ;;  %vm1314_vm10 = vcmp.gt.f32.partialorder %v1141_v38, 0.0 }
 0x255   :  { %v1145_v31 = vpop.f32.mrb[134].mxu1 }
 0x256   :  { %v1146_v45 = vadd.f32 %v3809_v15, %v1145_v31  ;;  %v2566_v9 = vpop.f32.mrb[135].mxu1  ;;  %v1441_v46 = vsel %vm1314_vm10, %v1141_v38, %v1378_v39 }
 0x257   :  { %2783 = vmatmul.mubr.f32.gmra.mrb[134].mxu0 %v1441_v46 }
 0x258   :  { %v1379_v49 = vmul.f32 %v3816_v18, %v1146_v45  ;;  %2785 = vmatprep.mubr.msk.f32.mxu0 %vm2946_vm0, %v2947_v6  ;;  %vm1315_vm11 = vcmp.gt.f32.partialorder %v1146_v45, 0.0 }
 0x259   :  { %v1150_v21 = vpop.f32.mrb[136].mxu1 }
 0x25a   :  { %v1151_v50 = vadd.f32 %v3809_v15, %v1150_v21  ;;  %v2569_v53 = vpop.f32.mrb[137].mxu1  ;;  %v1442_v42 = vsel %vm1315_vm11, %v1146_v45, %v1379_v49 }
 0x25b   :  { %2786 = vmatmul.mubr.f32.gmra.mrb[136].mxu0 %v1442_v42 }
 0x25c   :  { %v1380_v29 = vmul.f32 %v3816_v18, %v1151_v50  ;;  %2788 = vmatprep.mubr.msk.f32.mxu0 %vm2946_vm0, %v2947_v6  ;;  %vm1316_vm12 = vcmp.gt.f32.partialorder %v1151_v50, 0.0 }
 0x25d   :  { %v1155_v54 = vpop.f32.mrb[138].mxu1 }
 0x25e   :  { %v1156_v57 = vadd.f32 %v3809_v15, %v1155_v54  ;;  %v2572_v37 = vpop.f32.mrb[139].mxu1  ;;  %v1443_v59 = vsel %vm1316_vm12, %v1151_v50, %v1380_v29 }
 0x25f   :  { %2789 = vmatmul.mubr.f32.gmra.mrb[138].mxu0 %v1443_v59 }
 0x260   :  { %v1381_v44 = vmul.f32 %v3816_v18, %v1156_v57  ;;  %2791 = vmatprep.mubr.msk.f32.mxu0 %vm2946_vm0, %v2947_v6  ;;  %vm1317_vm13 = vcmp.gt.f32.partialorder %v1156_v57, 0.0 }
 0x261   :  { %v1160_v48 = vpop.f32.mrb[140].mxu1 }
 0x262   :  { %v1161_v56 = vadd.f32 %v3809_v15, %v1160_v48  ;;  %v2575_v60 = vpop.f32.mrb[141].mxu1  ;;  %v1444_v0 = vsel %vm1317_vm13, %v1156_v57, %v1381_v44 }
 0x263   :  { %2792 = vmatmul.mubr.f32.gmra.mrb[140].mxu0 %v1444_v0 }
 0x264   :  { %v1382_v61 = vmul.f32 %v3816_v18, %v1161_v56  ;;  %2794 = vmatprep.mubr.msk.f32.mxu0 %vm2946_vm0, %v2947_v6  ;;  %vm1318_vm14 = vcmp.gt.f32.partialorder %v1161_v56, 0.0 }
 0x265   :  { %v1165_v2 = vpop.f32.mrb[142].mxu1 }
 0x266   :  { %v1166_v51 = vadd.f32 %v3809_v15, %v1165_v2  ;;  %v2578_v8 = vpop.f32.mrb[143].mxu1  ;;  %v1445_v4 = vsel %vm1318_vm14, %v1161_v56, %v1382_v61  ;;  %vm1866_vm14 = vcmask 7168  }
 0x267   :  { %2795 = vmatmul.mubr.f32.gmra.mrb[142].mxu0 %v1445_v4 }
 0x268   :  { %v1383_v5 = vmul.f32 %v3816_v18, %v1166_v51  ;;  %2797 = vmatprep.mubr.msk.f32.mxu0 %vm2946_vm0, %v2947_v6  ;;  %vm1319_vm15 = vcmp.gt.f32.partialorder %v1166_v51, 0.0 }
 0x269   :  { %v1170_v7 = vpop.f32.mrb[144].mxu1 }
 0x26a   :  { %v1171_v16 = vadd.f32 %v3809_v15, %v1170_v7  ;;  %v2581_v58 = vpop.f32.mrb[145].mxu1  ;;  %v1446_v10 = vsel %vm1319_vm15, %v1166_v51, %v1383_v5 }
 0x26b   :  { %2798 = vmatmul.mubr.f32.gmra.mrb[144].mxu0 %v1446_v10 }
 0x26c   :  { %v1384_v25 = vmul.f32 %v3816_v18, %v1171_v16  ;;  %2800 = vmatprep.mubr.msk.f32.mxu0 %vm2946_vm0, %v2947_v6  ;;  %vm1320_vm1 = vcmp.gt.f32.partialorder %v1171_v16, 0.0 }
 0x26d   :  { %v1175_v12 = vpop.f32.mrb[146].mxu1 }
 0x26e   :  { %v1176_v40 = vadd.f32 %v3809_v15, %v1175_v12  ;;  %v2584_v17 = vpop.f32.mrb[147].mxu1  ;;  %v1447_v1 = vsel %vm1320_vm1, %v1171_v16, %v1384_v25  ;;  %v4068_v25 = vstv %s1936_s3 }
 0x26f   :  { %2801 = vmatmul.mubr.f32.gmra.mrb[146].mxu0 %v1447_v1 }
 0x270   :  { %v1385_v14 = vmul.f32 %v3816_v18, %v1176_v40  ;;  %2803 = vmatprep.mubr.msk.f32.mxu0 %vm2946_vm0, %v2947_v6  ;;  %vm1321_vm2 = vcmp.gt.f32.partialorder %v1176_v40, 0.0 }
 0x271   :  { %v1180_v52 = vpop.f32.mrb[148].mxu1 }
 0x272   :  { %v1181_v13 = vadd.f32 %v3809_v15, %v1180_v52  ;;  %v2587_v3 = vpop.f32.mrb[149].mxu1  ;;  %v1448_v62 = vsel %vm1321_vm2, %v1176_v40, %v1385_v14 }
 0x273   :  { %2804 = vmatmul.mubr.f32.gmra.mrb[148].mxu0 %v1448_v62 }
 0x274   :  { %v1386_v20 = vmul.f32 %v3816_v18, %v1181_v13  ;;  %2806 = vmatprep.mubr.msk.f32.mxu0 %vm2946_vm0, %v2947_v6  ;;  %vm1322_vm3 = vcmp.gt.f32.partialorder %v1181_v13, 0.0 }
 0x275   :  { %v1185_v30 = vpop.f32.mrb[150].mxu1 }
 0x276   :  { %v1186_v22 = vadd.f32 %v3809_v15, %v1185_v30  ;;  %v2590_v23 = vpop.f32.mrb[151].mxu1  ;;  %v1449_v27 = vsel %vm1322_vm3, %v1181_v13, %v1386_v20 }
 0x277   :  { %2807 = vmatmul.mubr.f32.gmra.mrb[150].mxu0 %v1449_v27 }
 0x278   :  { %v1387_v11 = vmul.f32 %v3816_v18, %v1186_v22  ;;  %2809 = vmatprep.mubr.msk.f32.mxu0 %vm2946_vm0, %v2947_v6  ;;  %vm1323_vm4 = vcmp.gt.f32.partialorder %v1186_v22, 0.0 }
 0x279   :  { %v1190_v24 = vpop.f32.mrb[152].mxu1 }
 0x27a   :  { %v1191_v26 = vadd.f32 %v3809_v15, %v1190_v24  ;;  %v2593_v34 = vpop.f32.mrb[153].mxu1  ;;  %v1450_v43 = vsel %vm1323_vm4, %v1186_v22, %v1387_v11 }
 0x27b   :  { %2810 = vmatmul.mubr.f32.gmra.mrb[152].mxu0 %v1450_v43 }
 0x27c   :  { %v1388_v28 = vmul.f32 %v3816_v18, %v1191_v26  ;;  %2812 = vmatprep.mubr.msk.f32.mxu0 %vm2946_vm0, %v2947_v6  ;;  %vm1324_vm5 = vcmp.gt.f32.partialorder %v1191_v26, 0.0 }
 0x27d   :  { %v1195_v32 = vpop.f32.mrb[154].mxu1 }
 0x27e   :  { %v1196_v47 = vadd.f32 %v3809_v15, %v1195_v32  ;;  %v2596_v19 = vpop.f32.mrb[155].mxu1  ;;  %v1451_v33 = vsel %vm1324_vm5, %v1191_v26, %v1388_v28 }
 0x27f   :  { %2813 = vmatmul.mubr.f32.gmra.mrb[154].mxu0 %v1451_v33 }
 0x280   :  { %v1389_v35 = vmul.f32 %v3816_v18, %v1196_v47  ;;  %2815 = vmatprep.mubr.msk.f32.mxu0 %vm2946_vm0, %v2947_v6  ;;  %vm1325_vm6 = vcmp.gt.f32.partialorder %v1196_v47, 0.0 }
 0x281   :  { %v1200_v55 = vpop.f32.mrb[156].mxu1 }
 0x282   :  { %v1201_v36 = vadd.f32 %v3809_v15, %v1200_v55  ;;  %v2599_v38 = vpop.f32.mrb[157].mxu1  ;;  %v1452_v63 = vsel %vm1325_vm6, %v1196_v47, %v1389_v35 }
 0x283   :  { %2816 = vmatmul.mubr.f32.gmra.mrb[156].mxu0 %v1452_v63 }
 0x284   :  { %v1390_v41 = vmul.f32 %v3816_v18, %v1201_v36  ;;  %2818 = vmatprep.mubr.msk.f32.mxu0 %vm2946_vm0, %v2947_v6  ;;  %vm1326_vm7 = vcmp.gt.f32.partialorder %v1201_v36, 0.0 }
 0x285   :  { %v1205_v39 = vpop.f32.mrb[158].mxu1 }
 0x286   :  { %v1206_v31 = vadd.f32 %v3809_v15, %v1205_v39  ;;  %v2602_v45 = vpop.f32.mrb[159].mxu1  ;;  %v1453_v9 = vsel %vm1326_vm7, %v1201_v36, %v1390_v41 }
 0x287   :  { %2819 = vmatmul.mubr.f32.gmra.mrb[158].mxu0 %v1453_v9 }
 0x288   :  { %v1391_v46 = vmul.f32 %v3816_v18, %v1206_v31  ;;  %2821 = vmatprep.mubr.msk.f32.mxu0 %vm2946_vm0, %v2947_v6  ;;  %vm1327_vm8 = vcmp.gt.f32.partialorder %v1206_v31, 0.0 }
 0x289   :  { %v1210_v49 = vpop.f32.mrb[160].mxu1 }
 0x28a   :  { %v1211_v21 = vadd.f32 %v3809_v15, %v1210_v49  ;;  %v2605_v50 = vpop.f32.mrb[161].mxu1  ;;  %v1454_v53 = vsel %vm1327_vm8, %v1206_v31, %v1391_v46 }
 0x28b   :  { %2822 = vmatmul.mubr.f32.gmra.mrb[160].mxu0 %v1454_v53 }
 0x28c   :  { %v1392_v42 = vmul.f32 %v3816_v18, %v1211_v21  ;;  %2824 = vmatprep.mubr.msk.f32.mxu0 %vm2946_vm0, %v2947_v6  ;;  %vm1328_vm9 = vcmp.gt.f32.partialorder %v1211_v21, 0.0 }
 0x28d   :  { %v1215_v29 = vpop.f32.mrb[162].mxu1 }
 0x28e   :  { %v1216_v54 = vadd.f32 %v3809_v15, %v1215_v29  ;;  %v2608_v57 = vpop.f32.mrb[163].mxu1  ;;  %v1455_v37 = vsel %vm1328_vm9, %v1211_v21, %v1392_v42 }
 0x28f   :  { %2825 = vmatmul.mubr.f32.gmra.mrb[162].mxu0 %v1455_v37 }
 0x290   :  { %v1393_v59 = vmul.f32 %v3816_v18, %v1216_v54  ;;  %2827 = vmatprep.mubr.msk.f32.mxu0 %vm2946_vm0, %v2947_v6  ;;  %vm1329_vm10 = vcmp.gt.f32.partialorder %v1216_v54, 0.0 }
 0x291   :  { %v1220_v44 = vpop.f32.mrb[164].mxu1 }
 0x292   :  { %v1221_v48 = vadd.f32 %v3809_v15, %v1220_v44  ;;  %v2611_v56 = vpop.f32.mrb[165].mxu1  ;;  %v1456_v60 = vsel %vm1329_vm10, %v1216_v54, %v1393_v59 }
 0x293   :  { %2828 = vmatmul.mubr.f32.gmra.mrb[164].mxu0 %v1456_v60 }
 0x294   :  { %v1394_v0 = vmul.f32 %v3816_v18, %v1221_v48  ;;  %2830 = vmatprep.mubr.msk.f32.mxu0 %vm2946_vm0, %v2947_v6  ;;  %vm1330_vm11 = vcmp.gt.f32.partialorder %v1221_v48, 0.0 }
 0x295   :  { %v1225_v61 = vpop.f32.mrb[166].mxu1 }
 0x296   :  { %v1226_v2 = vadd.f32 %v3809_v15, %v1225_v61  ;;  %v2614_v51 = vpop.f32.mrb[167].mxu1  ;;  %v1457_v8 = vsel %vm1330_vm11, %v1221_v48, %v1394_v0 }
 0x297   :  { %2831 = vmatmul.mubr.f32.gmra.mrb[166].mxu0 %v1457_v8 }
 0x298   :  { %v1395_v4 = vmul.f32 %v3816_v18, %v1226_v2  ;;  %2833 = vmatprep.mubr.msk.f32.mxu0 %vm2946_vm0, %v2947_v6  ;;  %vm1331_vm12 = vcmp.gt.f32.partialorder %v1226_v2, 0.0 }
 0x299   :  { %v1230_v5 = vpop.f32.mrb[168].mxu1 }
 0x29a   :  { %v1231_v7 = vadd.f32 %v3809_v15, %v1230_v5  ;;  %v2617_v16 = vpop.f32.mrb[169].mxu1  ;;  %v1458_v58 = vsel %vm1331_vm12, %v1226_v2, %v1395_v4 }
 0x29b   :  { %2834 = vmatmul.mubr.f32.gmra.mrb[168].mxu0 %v1458_v58 }
 0x29c   :  { %v1396_v10 = vmul.f32 %v3816_v18, %v1231_v7  ;;  %2836 = vmatprep.mubr.msk.f32.mxu0 %vm2946_vm0, %v2947_v6  ;;  %vm1332_vm13 = vcmp.gt.f32.partialorder %v1231_v7, 0.0 }
 0x29d   :  { %v1235_v12 = vpop.f32.mrb[170].mxu1 }
 0x29e   :  { %v1236_v40 = vadd.f32 %v3809_v15, %v1235_v12  ;;  %v2620_v17 = vpop.f32.mrb[171].mxu1  ;;  %v1552_v1 = vpop.f32.mrb[64].mxu0  ;;  %v1459_v14 = vsel %vm1332_vm13, %v1231_v7, %v1396_v10 }
 0x29f   :  { %v1553_v52 = vadd.f32 %v1552_v1, %v4068_v25  ;;  %v2679_v13 = vpop.f32.mrb[65].mxu0  ;;  %2837 = vmatmul.mubr.f32.gmra.mrb[170].mxu0 %v1459_v14 }
 0x2a0   :  { %v1397_v3 = vmul.f32 %v3816_v18, %v1236_v40  ;;  %2839 = vmatprep.mubr.msk.f32.mxu0 %vm2946_vm0, %v2947_v6  ;;  %vm1333_vm15 = vcmp.gt.f32.partialorder %v1236_v40, 0.0 }
 0x2a1   :  { %1867 = vst.msk [vmem:[%s4435_s7] sm:$0xff] %vm1866_vm14, %v1553_v52  ;;  %v1240_v62 = vpop.f32.mrb[172].mxu1 }
 0x2a2   :  { %v1241_v20 = vadd.f32 %v3809_v15, %v1240_v62  ;;  %v2623_v30 = vpop.f32.mrb[173].mxu1  ;;  %v1557_v22 = vpop.f32.mrb[66].mxu0  ;;  %v1460_v23 = vsel %vm1333_vm15, %v1236_v40, %v1397_v3  ;;  %v4093_v15 = vld [vmem:[%s4433_s5] ss:$0 sm:$0xff] }
 0x2a3   :  { %v1558_v27 = vadd.f32 %v1557_v22, %v4068_v25  ;;  %v2682_v11 = vpop.f32.mrb[67].mxu0  ;;  %2840 = vmatmul.mubr.f32.gmra.mrb[172].mxu0 %v1460_v23 }
 0x2a4   :  { %v1398_v24 = vmul.f32 %v3816_v18, %v1241_v20  ;;  %2842 = vmatprep.mubr.msk.f32.mxu0 %vm2946_vm0, %v2947_v6  ;;  %vm1334_vm1 = vcmp.gt.f32.partialorder %v1241_v20, 0.0 }
 0x2a5   :  { %1868 = vst.msk [vmem:[%s4435_s7 + $0x8] sm:$0xff] %vm1866_vm14, %v1558_v27  ;;  %v1245_v26 = vpop.f32.mrb[174].mxu1 }
 0x2a6   :  { %v1246_v34 = vadd.f32 %v4093_v15, %v1245_v26  ;;  %v2626_v43 = vpop.f32.mrb[175].mxu1  ;;  %v1562_v28 = vpop.f32.mrb[68].mxu0  ;;  %v1461_v32 = vsel %vm1334_vm1, %v1241_v20, %v1398_v24 }
 0x2a7   :  { %v1563_v47 = vadd.f32 %v1562_v28, %v4068_v25  ;;  %v2685_v19 = vpop.f32.mrb[69].mxu0  ;;  %2843 = vmatmul.mubr.f32.gmra.mrb[174].mxu0 %v1461_v32 }
 0x2a8   :  { %v1399_v33 = vmul.f32 %v3816_v18, %v1246_v34  ;;  %2845 = vmatprep.mubr.msk.f32.mxu0 %vm2946_vm0, %v2947_v6  ;;  %vm1335_vm2 = vcmp.gt.f32.partialorder %v1246_v34, 0.0 }
 0x2a9   :  { %1869 = vst.msk [vmem:[%s4435_s7 + $0x10] sm:$0xff] %vm1866_vm14, %v1563_v47  ;;  %v1250_v35 = vpop.f32.mrb[176].mxu1 }
 0x2aa   :  { %v1251_v55 = vadd.f32 %v4093_v15, %v1250_v35  ;;  %v2629_v36 = vpop.f32.mrb[177].mxu1  ;;  %v1567_v38 = vpop.f32.mrb[70].mxu0  ;;  %v1462_v63 = vsel %vm1335_vm2, %v1246_v34, %v1399_v33 }
 0x2ab   :  { %v1568_v41 = vadd.f32 %v1567_v38, %v4068_v25  ;;  %v2688_v39 = vpop.f32.mrb[71].mxu0  ;;  %2846 = vmatmul.mubr.f32.gmra.mrb[176].mxu0 %v1462_v63 }
 0x2ac   :  { %v1400_v31 = vmul.f32 %v3816_v18, %v1251_v55  ;;  %2848 = vmatprep.mubr.msk.f32.mxu0 %vm2946_vm0, %v2947_v6  ;;  %vm1336_vm3 = vcmp.gt.f32.partialorder %v1251_v55, 0.0 }
 0x2ad   :  { %1870 = vst.msk [vmem:[%s4435_s7 + $0x18] sm:$0xff] %vm1866_vm14, %v1568_v41  ;;  %v1255_v45 = vpop.f32.mrb[178].mxu1 }
 0x2ae   :  { %v1256_v9 = vadd.f32 %v4093_v15, %v1255_v45  ;;  %v2632_v46 = vpop.f32.mrb[179].mxu1  ;;  %v1572_v49 = vpop.f32.mrb[72].mxu0  ;;  %v1463_v21 = vsel %vm1336_vm3, %v1251_v55, %v1400_v31 }
 0x2af   :  { %v1573_v50 = vadd.f32 %v1572_v49, %v4068_v25  ;;  %v2691_v53 = vpop.f32.mrb[73].mxu0  ;;  %2849 = vmatmul.mubr.f32.gmra.mrb[178].mxu0 %v1463_v21 }
 0x2b0   :  { %v1401_v42 = vmul.f32 %v3816_v18, %v1256_v9  ;;  %2851 = vmatprep.mubr.msk.f32.mxu0 %vm2946_vm0, %v2947_v6  ;;  %vm1337_vm4 = vcmp.gt.f32.partialorder %v1256_v9, 0.0 }
 0x2b1   :  { %1871 = vst.msk [vmem:[%s4435_s7 + $0x20] sm:$0xff] %vm1866_vm14, %v1573_v50  ;;  %v1260_v29 = vpop.f32.mrb[180].mxu1 }
 0x2b2   :  { %v1261_v54 = vadd.f32 %v4093_v15, %v1260_v29  ;;  %v2635_v57 = vpop.f32.mrb[181].mxu1  ;;  %v1577_v37 = vpop.f32.mrb[74].mxu0  ;;  %v1464_v59 = vsel %vm1337_vm4, %v1256_v9, %v1401_v42 }
 0x2b3   :  { %v1578_v44 = vadd.f32 %v1577_v37, %v4068_v25  ;;  %v2694_v48 = vpop.f32.mrb[75].mxu0  ;;  %2852 = vmatmul.mubr.f32.gmra.mrb[180].mxu0 %v1464_v59 }
 0x2b4   :  { %v1402_v56 = vmul.f32 %v3816_v18, %v1261_v54  ;;  %2854 = vmatprep.mubr.msk.f32.mxu0 %vm2946_vm0, %v2947_v6  ;;  %vm1338_vm5 = vcmp.gt.f32.partialorder %v1261_v54, 0.0 }
 0x2b5   :  { %1872 = vst.msk [vmem:[%s4435_s7 + $0x28] sm:$0xff] %vm1866_vm14, %v1578_v44  ;;  %v1265_v60 = vpop.f32.mrb[182].mxu1 }
 0x2b6   :  { %v1266_v0 = vadd.f32 %v4093_v15, %v1265_v60  ;;  %v2638_v61 = vpop.f32.mrb[183].mxu1  ;;  %v1582_v2 = vpop.f32.mrb[76].mxu0  ;;  %v1465_v51 = vsel %vm1338_vm5, %v1261_v54, %v1402_v56 }
 0x2b7   :  { %v1583_v8 = vadd.f32 %v1582_v2, %v4068_v25  ;;  %v2697_v4 = vpop.f32.mrb[77].mxu0  ;;  %2855 = vmatmul.mubr.f32.gmra.mrb[182].mxu0 %v1465_v51 }
 0x2b8   :  { %v1403_v5 = vmul.f32 %v3816_v18, %v1266_v0  ;;  %2857 = vmatprep.mubr.msk.f32.mxu0 %vm2946_vm0, %v2947_v6  ;;  %vm1339_vm6 = vcmp.gt.f32.partialorder %v1266_v0, 0.0 }
 0x2b9   :  { %1873 = vst.msk [vmem:[%s4435_s7 + $0x30] sm:$0xff] %vm1866_vm14, %v1583_v8  ;;  %v1270_v7 = vpop.f32.mrb[184].mxu1 }
 0x2ba   :  { %v1271_v16 = vadd.f32 %v4093_v15, %v1270_v7  ;;  %v2641_v58 = vpop.f32.mrb[185].mxu1  ;;  %v1587_v10 = vpop.f32.mrb[78].mxu0  ;;  %v1466_v12 = vsel %vm1339_vm6, %v1266_v0, %v1403_v5 }
 0x2bb   :  { %v1588_v40 = vadd.f32 %v1587_v10, %v4068_v25  ;;  %v2700_v17 = vpop.f32.mrb[79].mxu0  ;;  %2858 = vmatmul.mubr.f32.gmra.mrb[184].mxu0 %v1466_v12 }
 0x2bc   :  { %v1404_v1 = vmul.f32 %v3816_v18, %v1271_v16  ;;  %2860 = vmatprep.mubr.msk.f32.mxu0 %vm2946_vm0, %v2947_v6  ;;  %vm1340_vm7 = vcmp.gt.f32.partialorder %v1271_v16, 0.0 }
 0x2bd   :  { %1874 = vst.msk [vmem:[%s4435_s7 + $0x38] sm:$0xff] %vm1866_vm14, %v1588_v40  ;;  %v1275_v14 = vpop.f32.mrb[186].mxu1 }
 0x2be   :  { %v1276_v52 = vadd.f32 %v4093_v15, %v1275_v14  ;;  %v2644_v13 = vpop.f32.mrb[187].mxu1  ;;  %v1592_v3 = vpop.f32.mrb[80].mxu0  ;;  %v1467_v62 = vsel %vm1340_vm7, %v1271_v16, %v1404_v1 }
 0x2bf   :  { %v1593_v20 = vadd.f32 %v1592_v3, %v4068_v25  ;;  %v2703_v30 = vpop.f32.mrb[81].mxu0  ;;  %2861 = vmatmul.mubr.f32.gmra.mrb[186].mxu0 %v1467_v62 }
 0x2c0   :  { %v1405_v22 = vmul.f32 %v3816_v18, %v1276_v52  ;;  %2863 = vmatprep.mubr.msk.f32.mxu0 %vm2946_vm0, %v2947_v6  ;;  %vm1341_vm8 = vcmp.gt.f32.partialorder %v1276_v52, 0.0 }
 0x2c1   :  { %1875 = vst.msk [vmem:[%s4435_s7 + $0x40] sm:$0xff] %vm1866_vm14, %v1593_v20 }
 0x2c2   :  { %v1597_v23 = vpop.f32.mrb[82].mxu0  ;;  %v1468_v27 = vsel %vm1341_vm8, %v1276_v52, %v1405_v22 }
 0x2c3   :  { %v1598_v11 = vadd.f32 %v1597_v23, %v4068_v25  ;;  %v2706_v24 = vpop.f32.mrb[83].mxu0  ;;  %2864 = vmatmul.mubr.f32.gmra.mrb[188].mxu0 %v1468_v27 }
 0x2c5   :  { %1876 = vst.msk [vmem:[%s4435_s7 + $0x48] sm:$0xff] %vm1866_vm14, %v1598_v11 }
 0x2c6   :  { %v1602_v18 = vpop.f32.mrb[84].mxu0 }
 0x2c7   :  { %v1603_v6 = vadd.f32 %v1602_v18, %v4068_v25  ;;  %v2709_v26 = vpop.f32.mrb[85].mxu0 }
 0x2c9   :  { %1877 = vst.msk [vmem:[%s4435_s7 + $0x50] sm:$0xff] %vm1866_vm14, %v1603_v6 }
 0x2ca   :  { %v1607_v15 = vpop.f32.mrb[86].mxu0 }
 0x2cb   :  { %v1608_v34 = vadd.f32 %v1607_v15, %v4068_v25  ;;  %v2712_v43 = vpop.f32.mrb[87].mxu0 }
 0x2cd   :  { %1878 = vst.msk [vmem:[%s4435_s7 + $0x58] sm:$0xff] %vm1866_vm14, %v1608_v34 }
 0x2ce   :  { %v1612_v28 = vpop.f32.mrb[88].mxu0 }
 0x2cf   :  { %v1613_v32 = vadd.f32 %v1612_v28, %v4068_v25  ;;  %v2715_v47 = vpop.f32.mrb[89].mxu0 }
 0x2d1   :  { %1879 = vst.msk [vmem:[%s4435_s7 + $0x60] sm:$0xff] %vm1866_vm14, %v1613_v32 }
 0x2d2   :  { %v1617_v19 = vpop.f32.mrb[90].mxu0 }
 0x2d3   :  { %v1618_v33 = vadd.f32 %v1617_v19, %v4068_v25  ;;  %v2718_v35 = vpop.f32.mrb[91].mxu0 }
 0x2d5   :  { %1880 = vst.msk [vmem:[%s4435_s7 + $0x68] sm:$0xff] %vm1866_vm14, %v1618_v33 }
 0x2d6   :  { %v1622_v55 = vpop.f32.mrb[92].mxu0 }
 0x2d7   :  { %v1623_v36 = vadd.f32 %v1622_v55, %v4068_v25  ;;  %v2721_v38 = vpop.f32.mrb[93].mxu0 }
 0x2d9   :  { %1881 = vst.msk [vmem:[%s4435_s7 + $0x70] sm:$0xff] %vm1866_vm14, %v1623_v36 }
 0x2da   :  { %v1627_v63 = vpop.f32.mrb[94].mxu0 }
 0x2db   :  { %v1628_v41 = vadd.f32 %v1627_v63, %v4068_v25  ;;  %v2724_v39 = vpop.f32.mrb[95].mxu0 }
 0x2dd   :  { %1882 = vst.msk [vmem:[%s4435_s7 + $0x78] sm:$0xff] %vm1866_vm14, %v1628_v41 }
 0x2de   :  { %v1632_v31 = vpop.f32.mrb[96].mxu0 }
 0x2df   :  { %v1633_v45 = vadd.f32 %v1632_v31, %v4068_v25  ;;  %v2727_v9 = vpop.f32.mrb[97].mxu0 }
 0x2e1   :  { %1883 = vst.msk [vmem:[%s4435_s7 + $0x80] sm:$0xff] %vm1866_vm14, %v1633_v45 }
 0x2e2   :  { %v1637_v46 = vpop.f32.mrb[98].mxu0 }
 0x2e3   :  { %v1638_v49 = vadd.f32 %v1637_v46, %v4068_v25  ;;  %v2730_v21 = vpop.f32.mrb[99].mxu0 }
 0x2e5   :  { %1884 = vst.msk [vmem:[%s4435_s7 + $0x88] sm:$0xff] %vm1866_vm14, %v1638_v49 }
 0x2e6   :  { %v1642_v50 = vpop.f32.mrb[100].mxu0 }
 0x2e7   :  { %v1643_v53 = vadd.f32 %v1642_v50, %v4068_v25  ;;  %v2733_v42 = vpop.f32.mrb[101].mxu0 }
 0x2e9   :  { %1885 = vst.msk [vmem:[%s4435_s7 + $0x90] sm:$0xff] %vm1866_vm14, %v1643_v53 }
 0x2ea   :  { %v1647_v29 = vpop.f32.mrb[102].mxu0 }
 0x2eb   :  { %v1648_v54 = vadd.f32 %v1647_v29, %v4068_v25  ;;  %v2736_v57 = vpop.f32.mrb[103].mxu0 }
 0x2ed   :  { %1886 = vst.msk [vmem:[%s4435_s7 + $0x98] sm:$0xff] %vm1866_vm14, %v1648_v54 }
 0x2ee   :  { %v1652_v37 = vpop.f32.mrb[104].mxu0 }
 0x2ef   :  { %v1653_v59 = vadd.f32 %v1652_v37, %v4068_v25  ;;  %v2739_v44 = vpop.f32.mrb[105].mxu0 }
 0x2f1   :  { %1887 = vst.msk [vmem:[%s4435_s7 + $0xa0] sm:$0xff] %vm1866_vm14, %v1653_v59 }
 0x2f2   :  { %v1657_v48 = vpop.f32.mrb[106].mxu0 }
 0x2f3   :  { %v1658_v56 = vadd.f32 %v1657_v48, %v4068_v25  ;;  %v2742_v60 = vpop.f32.mrb[107].mxu0 }
 0x2f5   :  { %1888 = vst.msk [vmem:[%s4435_s7 + $0xa8] sm:$0xff] %vm1866_vm14, %v1658_v56 }
 0x2f6   :  { %v1662_v0 = vpop.f32.mrb[108].mxu0 }
 0x2f7   :  { %v1663_v61 = vadd.f32 %v1662_v0, %v4068_v25  ;;  %v2745_v2 = vpop.f32.mrb[109].mxu0 }
 0x2f9   :  { %1889 = vst.msk [vmem:[%s4435_s7 + $0xb0] sm:$0xff] %vm1866_vm14, %v1663_v61 }
 0x2fa   :  { %v1667_v51 = vpop.f32.mrb[110].mxu0 }
 0x2fb   :  { %v1668_v8 = vadd.f32 %v1667_v51, %v4068_v25  ;;  %v2748_v4 = vpop.f32.mrb[111].mxu0 }
 0x2fd   :  { %1890 = vst.msk [vmem:[%s4435_s7 + $0xb8] sm:$0xff] %vm1866_vm14, %v1668_v8 }
 0x2fe   :  { %v1672_v5 = vpop.f32.mrb[112].mxu0 }
 0x2ff   :  { %v1673_v7 = vadd.f32 %v1672_v5, %v4068_v25  ;;  %v2751_v16 = vpop.f32.mrb[113].mxu0 }
 0x301   :  { %1891 = vst.msk [vmem:[%s4435_s7 + $0xc0] sm:$0xff] %vm1866_vm14, %v1673_v7 }
 0x302   :  { %v1677_v58 = vpop.f32.mrb[114].mxu0 }
 0x303   :  { %v1678_v10 = vadd.f32 %v1677_v58, %v4068_v25  ;;  %v2754_v12 = vpop.f32.mrb[115].mxu0 }
 0x305   :  { %1892 = vst.msk [vmem:[%s4435_s7 + $0xc8] sm:$0xff] %vm1866_vm14, %v1678_v10 }
 0x306   :  { %v1682_v40 = vpop.f32.mrb[116].mxu0 }
 0x307   :  { %v1683_v17 = vadd.f32 %v1682_v40, %v4068_v25  ;;  %v2757_v1 = vpop.f32.mrb[117].mxu0 }
 0x309   :  { %1893 = vst.msk [vmem:[%s4435_s7 + $0xd0] sm:$0xff] %vm1866_vm14, %v1683_v17 }
 0x30a   :  { %v1687_v14 = vpop.f32.mrb[118].mxu0 }
 0x30b   :  { %v1688_v52 = vadd.f32 %v1687_v14, %v4068_v25  ;;  %v2760_v13 = vpop.f32.mrb[119].mxu0 }
 0x30d   :  { %1894 = vst.msk [vmem:[%s4435_s7 + $0xd8] sm:$0xff] %vm1866_vm14, %v1688_v52 }
 0x30e   :  { %v1692_v3 = vpop.f32.mrb[120].mxu0 }
 0x30f   :  { %v1693_v62 = vadd.f32 %v1692_v3, %v4068_v25  ;;  %v2763_v20 = vpop.f32.mrb[121].mxu0 }
 0x311   :  { %1895 = vst.msk [vmem:[%s4435_s7 + $0xe0] sm:$0xff] %vm1866_vm14, %v1693_v62 }
 0x312   :  { %v1697_v30 = vpop.f32.mrb[122].mxu0 }
 0x313   :  { %v1698_v22 = vadd.f32 %v1697_v30, %v4068_v25  ;;  %v2766_v23 = vpop.f32.mrb[123].mxu0 }
 0x315   :  { %1896 = vst.msk [vmem:[%s4435_s7 + $0xe8] sm:$0xff] %vm1866_vm14, %v1698_v22 }
 0x316   :  { %v1702_v27 = vpop.f32.mrb[124].mxu0 }
 0x317   :  { %v1703_v11 = vadd.f32 %v1702_v27, %v4068_v25  ;;  %v2769_v24 = vpop.f32.mrb[125].mxu0 }
 0x319   :  { %1897 = vst.msk [vmem:[%s4435_s7 + $0xf0] sm:$0xff] %vm1866_vm14, %v1703_v11 }
 0x31a   :  { %v1707_v18 = vpop.f32.mrb[126].mxu0 }
 0x31b   :  { %v1708_v6 = vadd.f32 %v1707_v18, %v4068_v25  ;;  %v2772_v26 = vpop.f32.mrb[127].mxu0 }
 0x31d   :  { %1898 = vst.msk [vmem:[%s4435_s7 + $0xf8] sm:$0xff] %vm1866_vm14, %v1708_v6 }
 0x31e   :  { %v1712_v15 = vpop.f32.mrb[128].mxu0 }
 0x31f   :  { %v1713_v34 = vadd.f32 %v1712_v15, %v4068_v25  ;;  %v2775_v43 = vpop.f32.mrb[129].mxu0 }
 0x321   :  { %1899 = vst.msk [vmem:[%s4435_s7 + $0x100] sm:$0xff] %vm1866_vm14, %v1713_v34 }
 0x322   :  { %v1717_v28 = vpop.f32.mrb[130].mxu0 }
 0x323   :  { %v1718_v32 = vadd.f32 %v1717_v28, %v4068_v25  ;;  %v2778_v47 = vpop.f32.mrb[131].mxu0 }
 0x325   :  { %1900 = vst.msk [vmem:[%s4435_s7 + $0x108] sm:$0xff] %vm1866_vm14, %v1718_v32 }
 0x326   :  { %v1722_v19 = vpop.f32.mrb[132].mxu0 }
 0x327   :  { %v1723_v33 = vadd.f32 %v1722_v19, %v4068_v25  ;;  %v2781_v35 = vpop.f32.mrb[133].mxu0 }
 0x329   :  { %1901 = vst.msk [vmem:[%s4435_s7 + $0x110] sm:$0xff] %vm1866_vm14, %v1723_v33 }
 0x32a   :  { %v1727_v55 = vpop.f32.mrb[134].mxu0 }
 0x32b   :  { %v1728_v36 = vadd.f32 %v1727_v55, %v4068_v25  ;;  %v2784_v38 = vpop.f32.mrb[135].mxu0 }
 0x32d   :  { %1902 = vst.msk [vmem:[%s4435_s7 + $0x118] sm:$0xff] %vm1866_vm14, %v1728_v36 }
 0x32e   :  { %v1732_v63 = vpop.f32.mrb[136].mxu0 }
 0x32f   :  { %v1733_v41 = vadd.f32 %v1732_v63, %v4068_v25  ;;  %v2787_v39 = vpop.f32.mrb[137].mxu0 }
 0x331   :  { %1903 = vst.msk [vmem:[%s4435_s7 + $0x120] sm:$0xff] %vm1866_vm14, %v1733_v41 }
 0x332   :  { %v1737_v31 = vpop.f32.mrb[138].mxu0 }
 0x333   :  { %v1738_v45 = vadd.f32 %v1737_v31, %v4068_v25  ;;  %v2790_v9 = vpop.f32.mrb[139].mxu0 }
 0x335   :  { %1904 = vst.msk [vmem:[%s4435_s7 + $0x128] sm:$0xff] %vm1866_vm14, %v1738_v45 }
 0x336   :  { %v1742_v46 = vpop.f32.mrb[140].mxu0 }
 0x337   :  { %v1743_v49 = vadd.f32 %v1742_v46, %v4068_v25  ;;  %v2793_v21 = vpop.f32.mrb[141].mxu0 }
 0x339   :  { %1905 = vst.msk [vmem:[%s4435_s7 + $0x130] sm:$0xff] %vm1866_vm14, %v1743_v49 }
 0x33a   :  { %v1747_v50 = vpop.f32.mrb[142].mxu0 }
 0x33b   :  { %v1748_v53 = vadd.f32 %v1747_v50, %v4068_v25  ;;  %v2796_v42 = vpop.f32.mrb[143].mxu0 }
 0x33d   :  { %1906 = vst.msk [vmem:[%s4435_s7 + $0x138] sm:$0xff] %vm1866_vm14, %v1748_v53 }
 0x33e   :  { %v1752_v29 = vpop.f32.mrb[144].mxu0 }
 0x33f   :  { %v1753_v54 = vadd.f32 %v1752_v29, %v4068_v25  ;;  %v2799_v57 = vpop.f32.mrb[145].mxu0 }
 0x341   :  { %1907 = vst.msk [vmem:[%s4435_s7 + $0x140] sm:$0xff] %vm1866_vm14, %v1753_v54 }
 0x342   :  { %v1757_v37 = vpop.f32.mrb[146].mxu0 }
 0x343   :  { %v1758_v59 = vadd.f32 %v1757_v37, %v4068_v25  ;;  %v2802_v44 = vpop.f32.mrb[147].mxu0 }
 0x345   :  { %1908 = vst.msk [vmem:[%s4435_s7 + $0x148] sm:$0xff] %vm1866_vm14, %v1758_v59 }
 0x346   :  { %v1762_v48 = vpop.f32.mrb[148].mxu0 }
 0x347   :  { %v1763_v56 = vadd.f32 %v1762_v48, %v4068_v25  ;;  %v2805_v60 = vpop.f32.mrb[149].mxu0 }
 0x349   :  { %1909 = vst.msk [vmem:[%s4435_s7 + $0x150] sm:$0xff] %vm1866_vm14, %v1763_v56 }
 0x34a   :  { %v1767_v0 = vpop.f32.mrb[150].mxu0 }
 0x34b   :  { %v1768_v61 = vadd.f32 %v1767_v0, %v4068_v25  ;;  %v2808_v2 = vpop.f32.mrb[151].mxu0 }
 0x34d   :  { %1910 = vst.msk [vmem:[%s4435_s7 + $0x158] sm:$0xff] %vm1866_vm14, %v1768_v61 }
 0x34e   :  { %v1772_v51 = vpop.f32.mrb[152].mxu0 }
 0x34f   :  { %v1773_v8 = vadd.f32 %v1772_v51, %v4068_v25  ;;  %v2811_v4 = vpop.f32.mrb[153].mxu0 }
 0x351   :  { %1911 = vst.msk [vmem:[%s4435_s7 + $0x160] sm:$0xff] %vm1866_vm14, %v1773_v8 }
 0x352   :  { %v1777_v5 = vpop.f32.mrb[154].mxu0 }
 0x353   :  { %v1778_v7 = vadd.f32 %v1777_v5, %v4068_v25  ;;  %v2814_v16 = vpop.f32.mrb[155].mxu0 }
 0x355   :  { %1912 = vst.msk [vmem:[%s4435_s7 + $0x168] sm:$0xff] %vm1866_vm14, %v1778_v7 }
 0x356   :  { %v1782_v58 = vpop.f32.mrb[156].mxu0 }
 0x357   :  { %v1783_v10 = vadd.f32 %v1782_v58, %v4068_v25  ;;  %v2817_v12 = vpop.f32.mrb[157].mxu0 }
 0x359   :  { %1913 = vst.msk [vmem:[%s4435_s7 + $0x170] sm:$0xff] %vm1866_vm14, %v1783_v10 }
 0x35a   :  { %v1787_v40 = vpop.f32.mrb[158].mxu0 }
 0x35b   :  { %v1788_v17 = vadd.f32 %v1787_v40, %v4068_v25  ;;  %v2820_v1 = vpop.f32.mrb[159].mxu0 }
 0x35d   :  { %1914 = vst.msk [vmem:[%s4435_s7 + $0x178] sm:$0xff] %vm1866_vm14, %v1788_v17 }
 0x35e   :  { %v1792_v14 = vpop.f32.mrb[160].mxu0 }
 0x35f   :  { %v1793_v52 = vadd.f32 %v1792_v14, %v4068_v25  ;;  %v2823_v13 = vpop.f32.mrb[161].mxu0 }
 0x361   :  { %1915 = vst.msk [vmem:[%s4435_s7 + $0x180] sm:$0xff] %vm1866_vm14, %v1793_v52 }
 0x362   :  { %v1797_v3 = vpop.f32.mrb[162].mxu0 }
 0x363   :  { %v1798_v62 = vadd.f32 %v1797_v3, %v4068_v25  ;;  %v2826_v20 = vpop.f32.mrb[163].mxu0 }
 0x365   :  { %1916 = vst.msk [vmem:[%s4435_s7 + $0x188] sm:$0xff] %vm1866_vm14, %v1798_v62 }
 0x366   :  { %v1802_v30 = vpop.f32.mrb[164].mxu0 }
 0x367   :  { %v1803_v22 = vadd.f32 %v1802_v30, %v4068_v25  ;;  %v2829_v23 = vpop.f32.mrb[165].mxu0 }
 0x369   :  { %1917 = vst.msk [vmem:[%s4435_s7 + $0x190] sm:$0xff] %vm1866_vm14, %v1803_v22 }
 0x36a   :  { %v1807_v27 = vpop.f32.mrb[166].mxu0 }
 0x36b   :  { %v1808_v11 = vadd.f32 %v1807_v27, %v4068_v25  ;;  %v2832_v24 = vpop.f32.mrb[167].mxu0 }
 0x36d   :  { %1918 = vst.msk [vmem:[%s4435_s7 + $0x198] sm:$0xff] %vm1866_vm14, %v1808_v11 }
 0x36e   :  { %v1812_v18 = vpop.f32.mrb[168].mxu0 }
 0x36f   :  { %v1813_v6 = vadd.f32 %v1812_v18, %v4068_v25  ;;  %v2835_v26 = vpop.f32.mrb[169].mxu0 }
 0x371   :  { %1919 = vst.msk [vmem:[%s4435_s7 + $0x1a0] sm:$0xff] %vm1866_vm14, %v1813_v6 }
 0x372   :  { %v1817_v15 = vpop.f32.mrb[170].mxu0 }
 0x373   :  { %v1818_v34 = vadd.f32 %v1817_v15, %v4068_v25  ;;  %v2838_v43 = vpop.f32.mrb[171].mxu0 }
 0x375   :  { %1920 = vst.msk [vmem:[%s4435_s7 + $0x1a8] sm:$0xff] %vm1866_vm14, %v1818_v34 }
 0x376   :  { %v1822_v28 = vpop.f32.mrb[172].mxu0 }
 0x377   :  { %v1823_v32 = vadd.f32 %v1822_v28, %v4068_v25  ;;  %v2841_v47 = vpop.f32.mrb[173].mxu0 }
 0x379   :  { %1921 = vst.msk [vmem:[%s4435_s7 + $0x1b0] sm:$0xff] %vm1866_vm14, %v1823_v32 }
 0x37a   :  { %v1827_v19 = vpop.f32.mrb[174].mxu0 }
 0x37b   :  { %v1828_v33 = vadd.f32 %v1827_v19, %v4068_v25  ;;  %v2844_v35 = vpop.f32.mrb[175].mxu0 }
 0x37d   :  { %1922 = vst.msk [vmem:[%s4435_s7 + $0x1b8] sm:$0xff] %vm1866_vm14, %v1828_v33 }
 0x37e   :  { %v1832_v55 = vpop.f32.mrb[176].mxu0 }
 0x37f   :  { %v1833_v36 = vadd.f32 %v1832_v55, %v4068_v25  ;;  %v2847_v38 = vpop.f32.mrb[177].mxu0 }
 0x381   :  { %1923 = vst.msk [vmem:[%s4435_s7 + $0x1c0] sm:$0xff] %vm1866_vm14, %v1833_v36 }
 0x382   :  { %v1837_v63 = vpop.f32.mrb[178].mxu0 }
 0x383   :  { %v1838_v41 = vadd.f32 %v1837_v63, %v4068_v25  ;;  %v2850_v39 = vpop.f32.mrb[179].mxu0 }
 0x385   :  { %1924 = vst.msk [vmem:[%s4435_s7 + $0x1c8] sm:$0xff] %vm1866_vm14, %v1838_v41 }
 0x386   :  { %v1842_v31 = vpop.f32.mrb[180].mxu0 }
 0x387   :  { %v1843_v45 = vadd.f32 %v1842_v31, %v4068_v25  ;;  %v2853_v9 = vpop.f32.mrb[181].mxu0 }
 0x389   :  { %1925 = vst.msk [vmem:[%s4435_s7 + $0x1d0] sm:$0xff] %vm1866_vm14, %v1843_v45 }
 0x38a   :  { %v1847_v46 = vpop.f32.mrb[182].mxu0 }
 0x38b   :  { %v1848_v49 = vadd.f32 %v1847_v46, %v4068_v25  ;;  %v2856_v21 = vpop.f32.mrb[183].mxu0 }
 0x38d   :  { %1926 = vst.msk [vmem:[%s4435_s7 + $0x1d8] sm:$0xff] %vm1866_vm14, %v1848_v49 }
 0x38e   :  { %v1852_v50 = vpop.f32.mrb[184].mxu0 }
 0x38f   :  { %v1853_v53 = vadd.f32 %v1852_v50, %v4068_v25  ;;  %v2859_v42 = vpop.f32.mrb[185].mxu0 }
 0x391   :  { %1927 = vst.msk [vmem:[%s4435_s7 + $0x1e0] sm:$0xff] %vm1866_vm14, %v1853_v53 }
 0x392   :  { %v1857_v29 = vpop.f32.mrb[186].mxu0 }
 0x393   :  { %v1858_v54 = vadd.f32 %v1857_v29, %v4068_v25  ;;  %v2862_v57 = vpop.f32.mrb[187].mxu0 }
 0x395   :  { %1928 = vst.msk [vmem:[%s4435_s7 + $0x1e8] sm:$0xff] %vm1866_vm14, %v1858_v54 }
 0x396   :  { %v1862_v37 = vpop.f32.mrb[188].mxu0 }
 0x397   :  { %v1863_v59 = vadd.f32 %v1862_v37, %v4068_v25  ;;  %v2865_v44 = vpop.f32.mrb[189].mxu0 }
 0x399   :  { %1929 = vst.msk [vmem:[%s4435_s7 + $0x1f0] sm:$0xff] %vm1866_vm14, %v1863_v59 }
 0x39a   :  { %1934 = vsyncpa [#allocation3], 1 }

</bundles_post_ra>
